<compile_context>
chip_gen: v7x
topology: tpu7x:2x2x1
jax: 0.10.0
libtpu: 0.0.40
codegen_flags: <defaults>
</compile_context>

<pallas_src>
import functools

import jax
import jax.numpy as jnp
from jax.experimental import pallas as pl
from jax.experimental.pallas import tpu as pltpu


def _layer_norm(x, w, b, eps=1e-5):
    # PyTorch nn.LayerNorm: biased variance over last dim, eps inside sqrt.
    mu = jnp.mean(x, axis=-1, keepdims=True)
    var = jnp.mean((x - mu) ** 2, axis=-1, keepdims=True)
    return (x - mu) * jax.lax.rsqrt(var + eps) * w + b


def _gelu_exact(x):
    # PyTorch nn.GELU default (exact, erf-based).
    return 0.5 * x * (1.0 + jax.lax.erf(x * (1.0 / jnp.sqrt(2.0).astype(x.dtype))))


def transformer_stack_kernel(
    x_ref,
    ln1w_ref, ln1b_ref, wqkv_ref, wout_ref, bout_ref,
    ln2w_ref, ln2b_ref, w1_ref, b1_ref, w2_ref, b2_ref,
    attn_out_ref, ff_out_ref,
    x_scratch,
    *, heads, dim_head, seq_len,
):
    layer = pl.program_id(1)
    rows, dim = x_scratch.shape
    bt = rows // seq_len
    inner = heads * dim_head
    bf16 = jnp.bfloat16

    # Load the input activation into the VMEM-resident carry only at layer 0;
    # later layers consume the previous layer's output from scratch.
    @pl.when(layer == 0)
    def _():
        x_scratch[...] = x_ref[...]

    x = x_scratch[...]  # (rows, dim) float32

    # ---- PreNorm + Attention (no residual, see note at top) ----
    y = _layer_norm(x, ln1w_ref[0], ln1b_ref[0])
    # Wqkv is bf16 with the 1/sqrt(dim_head) scale pre-folded into Q columns.
    qkv = jnp.dot(y.astype(bf16), wqkv_ref[0],
                  preferred_element_type=jnp.float32)          # (rows, 3*inner) f32
    qkv_bf = qkv.astype(bf16)

    # Static per-head loop (heads <= 3 for KWT); scores/softmax batched over
    # the batch dim via single-batch-dim einsums.
    # TODO(synk): fold heads into a single batched dot_general once Mosaic
    # supports multi-batch-dim dot_general / the needed transpose cheaply.
    head_outs = []
    for h in range(heads):
        lo = h * dim_head
        hi = lo + dim_head
        qh = qkv_bf[:, lo:hi].reshape(bt, seq_len, dim_head)
        kh = qkv_bf[:, inner + lo:inner + hi].reshape(bt, seq_len, dim_head)
        vh = qkv_bf[:, 2 * inner + lo:2 * inner + hi].reshape(bt, seq_len, dim_head)

        dots = jnp.einsum('bqd,bkd->bqk', qh, kh,
                          preferred_element_type=jnp.float32)   # (bt, n, n) f32
        dots = dots - jnp.max(dots, axis=-1, keepdims=True)
        e = jnp.exp(dots)
        p = e * pl.reciprocal(jnp.sum(e, axis=-1, keepdims=True), approx=True)

        oh = jnp.einsum('bqk,bkd->bqd', p.astype(bf16), vh,
                        preferred_element_type=jnp.float32)     # (bt, n, dim_head)
        head_outs.append(oh)

    # Single output projection with K = inner (fills the MXU contraction
    # width) instead of `heads` K=dim_head matmuls + accumulator adds.
    o = head_outs[0] if heads == 1 else jnp.concatenate(head_outs, axis=-1)
    o = o.reshape(rows, inner)                                  # leading-dim merge
    attn_x = jnp.dot(o.astype(bf16), wout_ref[0],
                     preferred_element_type=jnp.float32) + bout_ref[0]
    attn_out_ref[0] = attn_x.astype(attn_out_ref.dtype)         # (rows, dim) store

    # ---- PreNorm + FeedForward (no residual) ----
    y2 = _layer_norm(attn_x, ln2w_ref[0], ln2b_ref[0])
    h1 = jnp.dot(y2.astype(bf16), w1_ref[0],
                 preferred_element_type=jnp.float32) + b1_ref[0]
    h1 = _gelu_exact(h1)
    ff_x = jnp.dot(h1.astype(bf16), w2_ref[0],
                   preferred_element_type=jnp.float32) + b2_ref[0]
    ff_out_ref[0] = ff_x.astype(ff_out_ref.dtype)

    # Carry the activation to the next layer without leaving VMEM.
    x_scratch[...] = ff_x


def prepare_params(params, *, dim_head):
    """One-time host/trace-time transform of the f32 model params for the kernel:

      * fold the attention scale (dim_head ** -0.5) into the Q columns of Wqkv,
      * store all matmul weights (Wqkv, Wout, W1, W2) in bfloat16,
      * keep LayerNorm weights/biases and matmul biases in float32.
    """
    (ln1w, ln1b, wqkv, wout, bout, ln2w, ln2b, w1, b1, w2, b2) = params
    inner = wout.shape[1]
    scale = dim_head ** -0.5
    wqkv_scaled = wqkv.at[:, :, :inner].multiply(scale)
    return (ln1w, ln1b,
            wqkv_scaled.astype(jnp.bfloat16),
            wout.astype(jnp.bfloat16), bout,
            ln2w, ln2b,
            w1.astype(jnp.bfloat16), b1,
            w2.astype(jnp.bfloat16), b2)


def transformer_forward(x, kernel_params, *, heads, dim_head, batch_tiles=1,
                        out_dtype=None):
    """Mirrors KWT.Transformer.forward: returns (x, hidden_states, attentions).

    All `depth` layers run in ONE pallas_call.  `batch_tiles` splits the batch
    across grid steps (set to 2 on v7x so the 'parallel' batch axis shards
    across both TensorCores; 1 for v5e/v6e).  `out_dtype` can be set to
    jnp.bfloat16 to halve the hidden_states/attentions HBM writeback if the
    caller can tolerate it (default: input dtype).
    """
    b, n, dim = x.shape
    (ln1w, ln1b, wqkv, wout, bout, ln2w, ln2b, w1, b1, w2, b2) = kernel_params
    depth = ln1w.shape[0]
    mlp_dim = w1.shape[-1]
    inner = heads * dim_head
    out_dtype = x.dtype if out_dtype is None else out_dtype
    assert b % batch_tiles == 0, "batch must be divisible by batch_tiles"
    bt = b // batch_tiles
    rows = bt * n
    assert batch_tiles == 1 or rows % 8 == 0, "per-tile rows must be 8-aligned"

    # Flatten activations once in the wrapper so the kernel works on a plain
    # (rows, dim) slab and the output stores need no in-kernel reshape.
    x2 = x.reshape(b * n, dim)

    def wspec(shape):
        zeros = (0,) * len(shape)
        return pl.BlockSpec((1,) + shape, lambda i, l: (l,) + zeros)

    in_specs = [
        pl.BlockSpec((rows, dim), lambda i, l: (i, 0)),       # x (read at layer 0)
        wspec((1, dim)), wspec((1, dim)),                     # ln1 w, b       (f32)
        wspec((dim, 3 * inner)),                              # Wqkv           (bf16)
        wspec((inner, dim)), wspec((1, dim)),                 # Wout (bf16), bout (f32)
        wspec((1, dim)), wspec((1, dim)),                     # ln2 w, b       (f32)
        wspec((dim, mlp_dim)), wspec((1, mlp_dim)),           # W1 (bf16), b1  (f32)
        wspec((mlp_dim, dim)), wspec((1, dim)),               # W2 (bf16), b2  (f32)
    ]
    out_specs = [
        pl.BlockSpec((1, rows, dim), lambda i, l: (l, i, 0)),
        pl.BlockSpec((1, rows, dim), lambda i, l: (l, i, 0)),
    ]

    # Explicit VMEM budget: double-buffered bf16 weight blocks + resident
    # activation scratch + in/out blocks + matmul/attention intermediates,
    # with 2x headroom, clamped to [32 MiB, 64 MiB] so it is legal on v7x.
    w_bytes = 2 * 2 * (dim * 3 * inner + inner * dim + dim * mlp_dim + mlp_dim * dim)
    act_bytes = rows * dim * 4 * (1 + 2) + 2 * 2 * rows * dim * 4
    tmp_bytes = rows * (3 * inner + mlp_dim) * 4 + heads * bt * n * n * 4
    vmem_limit = int(min(max(2 * (w_bytes + act_bytes + tmp_bytes),
                             32 * 1024 * 1024), 64 * 1024 * 1024))

    kern = functools.partial(transformer_stack_kernel,
                             heads=heads, dim_head=dim_head, seq_len=n)

    attn_all, ff_all = pl.pallas_call(
        kern,
        out_shape=(jax.ShapeDtypeStruct((depth, b * n, dim), out_dtype),
                   jax.ShapeDtypeStruct((depth, b * n, dim), out_dtype)),
        grid_spec=pltpu.PrefetchScalarGridSpec(
            num_scalar_prefetch=0,
            # Depth MUST stay the innermost, "arbitrary" axis: the x_scratch
            # carry relies on layers executing in order within a batch tile.
            grid=(batch_tiles, depth),
            in_specs=in_specs,
            out_specs=out_specs,
            scratch_shapes=[pltpu.VMEM((rows, dim), jnp.float32)],
        ),
        compiler_params=pltpu.CompilerParams(
            dimension_semantics=("parallel", "arbitrary"),
            vmem_limit_bytes=vmem_limit),
    )(x2, ln1w, ln1b, wqkv, wout, bout, ln2w, ln2b, w1, b1, w2, b2)

    attn_all = attn_all.reshape(depth, b, n, dim)
    ff_all = ff_all.reshape(depth, b, n, dim)
    attentions = [attn_all[l] for l in range(depth)]
    hidden_states = [ff_all[l] for l in range(depth)]
    return hidden_states[-1], hidden_states, attentions


def init_transformer_params(key, dim, depth, heads, dim_head, mlp_dim):
    inner = heads * dim_head
    keys = jax.random.split(key, 4)
    ln1w = jnp.ones((depth, 1, dim), jnp.float32)
    ln1b = jnp.zeros((depth, 1, dim), jnp.float32)
    wqkv = 0.05 * jax.random.normal(keys[0], (depth, dim, 3 * inner), jnp.float32)
    wout = 0.05 * jax.random.normal(keys[1], (depth, inner, dim), jnp.float32)
    bout = jnp.zeros((depth, 1, dim), jnp.float32)
    ln2w = jnp.ones((depth, 1, dim), jnp.float32)
    ln2b = jnp.zeros((depth, 1, dim), jnp.float32)
    w1 = 0.05 * jax.random.normal(keys[2], (depth, dim, mlp_dim), jnp.float32)
    b1 = jnp.zeros((depth, 1, mlp_dim), jnp.float32)
    w2 = 0.05 * jax.random.normal(keys[3], (depth, mlp_dim, dim), jnp.float32)
    b2 = jnp.zeros((depth, 1, dim), jnp.float32)
    return (ln1w, ln1b, wqkv, wout, bout, ln2w, ln2b, w1, b1, w2, b2)


def _reference_forward(x, params, *, heads, dim_head):
    """Pure-JAX f32 reference with the same (no-residual) semantics."""
    (ln1w, ln1b, wqkv, wout, bout, ln2w, ln2b, w1, b1, w2, b2) = params
    depth = ln1w.shape[0]
    b, n, dim = x.shape
    inner = heads * dim_head
    scale = dim_head ** -0.5
    hs, atts = [], []
    for l in range(depth):
        y = _layer_norm(x, ln1w[l], ln1b[l])
        qkv = y @ wqkv[l]
        q, k, v = jnp.split(qkv, 3, axis=-1)

        def to_heads(t):
            return t.reshape(b, n, heads, dim_head).transpose(0, 2, 1, 3)

        q, k, v = to_heads(q), to_heads(k), to_heads(v)
        dots = jnp.einsum('bhqd,bhkd->bhqk', q, k) * scale
        p = jax.nn.softmax(dots, axis=-1)
        o = jnp.einsum('bhqk,bhkd->bhqd', p, v)
        o = o.transpose(0, 2, 1, 3).reshape(b, n, inner)
        ax = o @ wout[l] + bout[l]
        atts.append(ax)
        y2 = _layer_norm(ax, ln2w[l], ln2b[l])
        hdn = _gelu_exact(y2 @ w1[l] + b1[l])
        x = hdn @ w2[l] + b2[l]
        hs.append(x)
    return x, hs, atts


if __name__ == "__main__":
    # Small shapes consistent with the module: batch=2, seq=8, dim=32,
    # depth=2, heads=2, dim_head=8 (inner=16), mlp_dim=64, dropout=0.0.
    B, N, DIM = 2, 8, 32
    DEPTH, HEADS, DIM_HEAD, MLP_DIM = 2, 2, 8, 64

    key = jax.random.PRNGKey(0)
    kx, kp = jax.random.split(key)
    x = jax.random.normal(kx, (B, N, DIM), jnp.float32)
    params = init_transformer_params(kp, DIM, DEPTH, HEADS, DIM_HEAD, MLP_DIM)
    kparams = prepare_params(params, dim_head=DIM_HEAD)

    out, hidden_states, attentions = transformer_forward(
        x, kparams, heads=HEADS, dim_head=DIM_HEAD, batch_tiles=1)
    jax.block_until_ready(out)
    for t in hidden_states + attentions:
        jax.block_until_ready(t)

    assert out.shape == (B, N, DIM)
    assert len(hidden_states) == DEPTH and len(attentions) == DEPTH

    # Tolerance check vs. pure-JAX f32 reference (bf16 weights/MXU operands,
    # the pre-folded scale and the approx softmax reciprocal introduce small,
    # bounded error).
    ref_out, ref_hs, ref_atts = _reference_forward(
        x, params, heads=HEADS, dim_head=DIM_HEAD)
    max_err = max(
        float(jnp.max(jnp.abs(out - ref_out))),
        max(float(jnp.max(jnp.abs(a - b))) for a, b in zip(attentions, ref_atts)),
        max(float(jnp.max(jnp.abs(a - b))) for a, b in zip(hidden_states, ref_hs)),
    )
    assert max_err < 5e-2, f"max abs error vs reference too large: {max_err}"

    print("KERNEL_OK")
</pallas_src>

<mosaic_0001>
module attributes {stable_mosaic.version = 11 : i64} {
  func.func @transformer_stack_kernel(%arg0: i32, %arg1: i32, %arg2: memref<16x32xf32, #tpu.memory_space<vmem>>, %arg3: memref<1x1x32xf32, #tpu.memory_space<vmem>>, %arg4: memref<1x1x32xf32, #tpu.memory_space<vmem>>, %arg5: memref<1x32x48xbf16, #tpu.memory_space<vmem>>, %arg6: memref<1x16x32xbf16, #tpu.memory_space<vmem>>, %arg7: memref<1x1x32xf32, #tpu.memory_space<vmem>>, %arg8: memref<1x1x32xf32, #tpu.memory_space<vmem>>, %arg9: memref<1x1x32xf32, #tpu.memory_space<vmem>>, %arg10: memref<1x32x64xbf16, #tpu.memory_space<vmem>>, %arg11: memref<1x1x64xf32, #tpu.memory_space<vmem>>, %arg12: memref<1x64x32xbf16, #tpu.memory_space<vmem>>, %arg13: memref<1x1x32xf32, #tpu.memory_space<vmem>>, %arg14: memref<1x16x32xf32, #tpu.memory_space<vmem>>, %arg15: memref<1x16x32xf32, #tpu.memory_space<vmem>>, %arg16: memref<16x32xf32, #tpu.memory_space<vmem>>) attributes {dimension_semantics = [#tpu.dimension_semantics<parallel>, #tpu.dimension_semantics<arbitrary>], iteration_bounds = array<i64: 1, 2>, scalar_prefetch = 0 : i64, scratch_operands = 1 : i64, tpu.core_type = #tpu.core_type<tc>, window_params = [{transform_indices = @transform_0, window_bounds = array<i64: 16, 32>}, {transform_indices = @transform_1, window_bounds = array<i64: 1, 1, 32>}, {transform_indices = @transform_2, window_bounds = array<i64: 1, 1, 32>}, {transform_indices = @transform_3, window_bounds = array<i64: 1, 32, 48>}, {transform_indices = @transform_4, window_bounds = array<i64: 1, 16, 32>}, {transform_indices = @transform_5, window_bounds = array<i64: 1, 1, 32>}, {transform_indices = @transform_6, window_bounds = array<i64: 1, 1, 32>}, {transform_indices = @transform_7, window_bounds = array<i64: 1, 1, 32>}, {transform_indices = @transform_8, window_bounds = array<i64: 1, 32, 64>}, {transform_indices = @transform_9, window_bounds = array<i64: 1, 1, 64>}, {transform_indices = @transform_10, window_bounds = array<i64: 1, 64, 32>}, {transform_indices = @transform_11, window_bounds = array<i64: 1, 1, 32>}, {transform_indices = @transform_12, window_bounds = array<i64: 1, 16, 32>}, {transform_indices = @transform_13, window_bounds = array<i64: 1, 16, 32>}]} {
    %c0_i32 = arith.constant 0 : i32
    %0 = arith.cmpi eq, %arg1, %c0_i32 : i32
    %1 = arith.extui %0 : i1 to i32
    %c0_i32_0 = arith.constant 0 : i32
    %2 = arith.cmpi ne, %1, %c0_i32_0 : i32
    scf.if %2 {
      %c0_68 = arith.constant 0 : index
      %c0_69 = arith.constant 0 : index
      %142 = vector.load %arg2[%c0_68, %c0_69] : memref<16x32xf32, #tpu.memory_space<vmem>>, vector<16x32xf32>
      %c0_70 = arith.constant 0 : index
      %c0_71 = arith.constant 0 : index
      %143 = vector.load %arg16[%c0_70, %c0_71] : memref<16x32xf32, #tpu.memory_space<vmem>>, vector<16x32xf32>
      tpu.vector_store %arg16[%c0_70, %c0_71], %142 {strides = array<i32>} : memref<16x32xf32, #tpu.memory_space<vmem>>, vector<16x32xf32>,
    } else {
    }
    %c0 = arith.constant 0 : index
    %c0_1 = arith.constant 0 : index
    %3 = vector.load %arg16[%c0, %c0_1] : memref<16x32xf32, #tpu.memory_space<vmem>>, vector<16x32xf32>
    %c0_2 = arith.constant 0 : index
    %c0_3 = arith.constant 0 : index
    %c0_4 = arith.constant 0 : index
    %4 = vector.load %arg3[%c0_2, %c0_3, %c0_4] : memref<1x1x32xf32, #tpu.memory_space<vmem>>, vector<1x1x32xf32>
    %5 = vector.shape_cast %4 : vector<1x1x32xf32> to vector<1x32xf32>
    %c0_5 = arith.constant 0 : index
    %c0_6 = arith.constant 0 : index
    %c0_7 = arith.constant 0 : index
    %6 = vector.load %arg4[%c0_5, %c0_6, %c0_7] : memref<1x1x32xf32, #tpu.memory_space<vmem>>, vector<1x1x32xf32>
    %7 = vector.shape_cast %6 : vector<1x1x32xf32> to vector<1x32xf32>
    %cst = arith.constant dense<0.000000e+00> : vector<16xf32>
    %8 = vector.multi_reduction <add>, %3, %cst [1] : vector<16x32xf32> to vector<16xf32>
    %9 = vector.shape_cast %8 : vector<16xf32> to vector<16x1xf32>
    %cst_8 = arith.constant 3.200000e+01 : f32
    %10 = vector.broadcast %cst_8 : f32 to vector<16x1xf32>
    %11 = arith.divf %9, %10 : vector<16x1xf32>
    %12 = vector.broadcast %11 : vector<16x1xf32> to vector<16x32xf32>
    %13 = arith.subf %3, %12 : vector<16x32xf32>
    %14 = arith.mulf %13, %13 : vector<16x32xf32>
    %cst_9 = arith.constant dense<0.000000e+00> : vector<16xf32>
    %15 = vector.multi_reduction <add>, %14, %cst_9 [1] : vector<16x32xf32> to vector<16xf32>
    %16 = vector.shape_cast %15 : vector<16xf32> to vector<16x1xf32>
    %cst_10 = arith.constant 3.200000e+01 : f32
    %17 = vector.broadcast %cst_10 : f32 to vector<16x1xf32>
    %18 = arith.divf %16, %17 : vector<16x1xf32>
    %19 = vector.broadcast %11 : vector<16x1xf32> to vector<16x32xf32>
    %20 = arith.subf %3, %19 : vector<16x32xf32>
    %cst_11 = arith.constant 9.99999974E-6 : f32
    %21 = vector.broadcast %cst_11 : f32 to vector<16x1xf32>
    %22 = arith.addf %18, %21 : vector<16x1xf32>
    %23 = math.rsqrt %22 : vector<16x1xf32>
    %24 = vector.broadcast %23 : vector<16x1xf32> to vector<16x32xf32>
    %25 = arith.mulf %20, %24 : vector<16x32xf32>
    %26 = vector.broadcast %5 : vector<1x32xf32> to vector<16x32xf32>
    %27 = arith.mulf %25, %26 : vector<16x32xf32>
    %28 = vector.broadcast %7 : vector<1x32xf32> to vector<16x32xf32>
    %29 = arith.addf %27, %28 : vector<16x32xf32>
    %30 = arith.truncf %29 : vector<16x32xf32> to vector<16x32xbf16>
    %c0_12 = arith.constant 0 : index
    %c0_13 = arith.constant 0 : index
    %c0_14 = arith.constant 0 : index
    %31 = vector.load %arg5[%c0_12, %c0_13, %c0_14] : memref<1x32x48xbf16, #tpu.memory_space<vmem>>, vector<1x32x48xbf16>
    %32 = vector.shape_cast %31 : vector<1x32x48xbf16> to vector<32x48xbf16>
    %cst_15 = arith.constant dense<0.000000e+00> : vector<16x48xf32>
    %33 = tpu.matmul %30, %32, %cst_15 {dimension_numbers = #tpu.dot_dimension_numbers<[1], [0], [0], [1], [0, 0, 1, 1], [], []>} : vector<16x32xbf16>, vector<32x48xbf16>, vector<16x48xf32> -> vector<16x48xf32>
    %34 = arith.truncf %33 : vector<16x48xf32> to vector<16x48xbf16>
    %35 = vector.extract_strided_slice %34 {offsets = [0, 0], sizes = [16, 8], strides = [1, 1]} : vector<16x48xbf16> to vector<16x8xbf16>
    %36 = vector.shape_cast %35 : vector<16x8xbf16> to vector<2x8x8xbf16>
    %37 = vector.extract_strided_slice %34 {offsets = [0, 16], sizes = [16, 8], strides = [1, 1]} : vector<16x48xbf16> to vector<16x8xbf16>
    %38 = vector.shape_cast %37 : vector<16x8xbf16> to vector<2x8x8xbf16>
    %39 = vector.extract_strided_slice %34 {offsets = [0, 32], sizes = [16, 8], strides = [1, 1]} : vector<16x48xbf16> to vector<16x8xbf16>
    %40 = vector.shape_cast %39 : vector<16x8xbf16> to vector<2x8x8xbf16>
    "tpu.trace_start"() <{level = 10 : i32, message = "bqd,bkd->bqk"}> : () -> ()
    %cst_16 = arith.constant dense<0.000000e+00> : vector<2x8x8xf32>
    %41 = tpu.matmul %36, %38, %cst_16 {dimension_numbers = #tpu.dot_dimension_numbers<[2], [2], [1], [1], [0, 0, 0, 1, 1, 1], [0], [0]>} : vector<2x8x8xbf16>, vector<2x8x8xbf16>, vector<2x8x8xf32> -> vector<2x8x8xf32>
    "tpu.trace_stop"() : () -> ()
    %cst_17 = arith.constant dense<0xFF800000> : vector<2x8xf32>
    %42 = vector.multi_reduction <maximumf>, %41, %cst_17 [2] : vector<2x8x8xf32> to vector<2x8xf32>
    %43 = vector.shape_cast %42 : vector<2x8xf32> to vector<2x8x1xf32>
    %44 = vector.broadcast %43 : vector<2x8x1xf32> to vector<2x8x8xf32>
    %45 = arith.subf %41, %44 : vector<2x8x8xf32>
    %46 = math.exp %45 : vector<2x8x8xf32>
    %cst_18 = arith.constant dense<0.000000e+00> : vector<2x8xf32>
    %47 = vector.multi_reduction <add>, %46, %cst_18 [2] : vector<2x8x8xf32> to vector<2x8xf32>
    %48 = vector.shape_cast %47 : vector<2x8xf32> to vector<2x8x1xf32>
    %49 = tpu.reciprocal %48 {approx = true} : vector<2x8x1xf32> -> vector<2x8x1xf32>
    %50 = vector.broadcast %49 : vector<2x8x1xf32> to vector<2x8x8xf32>
    %51 = arith.mulf %46, %50 : vector<2x8x8xf32>
    %52 = arith.truncf %51 : vector<2x8x8xf32> to vector<2x8x8xbf16>
    "tpu.trace_start"() <{level = 10 : i32, message = "bqk,bkd->bqd"}> : () -> ()
    %cst_19 = arith.constant dense<0.000000e+00> : vector<2x8x8xf32>
    %53 = tpu.matmul %52, %40, %cst_19 {dimension_numbers = #tpu.dot_dimension_numbers<[2], [1], [1], [2], [0, 0, 0, 1, 1, 2], [0], [0]>} : vector<2x8x8xbf16>, vector<2x8x8xbf16>, vector<2x8x8xf32> -> vector<2x8x8xf32>
    "tpu.trace_stop"() : () -> ()
    %54 = vector.extract_strided_slice %34 {offsets = [0, 8], sizes = [16, 8], strides = [1, 1]} : vector<16x48xbf16> to vector<16x8xbf16>
    %55 = vector.shape_cast %54 : vector<16x8xbf16> to vector<2x8x8xbf16>
    %56 = vector.extract_strided_slice %34 {offsets = [0, 24], sizes = [16, 8], strides = [1, 1]} : vector<16x48xbf16> to vector<16x8xbf16>
    %57 = vector.shape_cast %56 : vector<16x8xbf16> to vector<2x8x8xbf16>
    %58 = vector.extract_strided_slice %34 {offsets = [0, 40], sizes = [16, 8], strides = [1, 1]} : vector<16x48xbf16> to vector<16x8xbf16>
    %59 = vector.shape_cast %58 : vector<16x8xbf16> to vector<2x8x8xbf16>
    "tpu.trace_start"() <{level = 10 : i32, message = "bqd,bkd->bqk"}> : () -> ()
    %cst_20 = arith.constant dense<0.000000e+00> : vector<2x8x8xf32>
    %60 = tpu.matmul %55, %57, %cst_20 {dimension_numbers = #tpu.dot_dimension_numbers<[2], [2], [1], [1], [0, 0, 0, 1, 1, 1], [0], [0]>} : vector<2x8x8xbf16>, vector<2x8x8xbf16>, vector<2x8x8xf32> -> vector<2x8x8xf32>
    "tpu.trace_stop"() : () -> ()
    %cst_21 = arith.constant dense<0xFF800000> : vector<2x8xf32>
    %61 = vector.multi_reduction <maximumf>, %60, %cst_21 [2] : vector<2x8x8xf32> to vector<2x8xf32>
    %62 = vector.shape_cast %61 : vector<2x8xf32> to vector<2x8x1xf32>
    %63 = vector.broadcast %62 : vector<2x8x1xf32> to vector<2x8x8xf32>
    %64 = arith.subf %60, %63 : vector<2x8x8xf32>
    %65 = math.exp %64 : vector<2x8x8xf32>
    %cst_22 = arith.constant dense<0.000000e+00> : vector<2x8xf32>
    %66 = vector.multi_reduction <add>, %65, %cst_22 [2] : vector<2x8x8xf32> to vector<2x8xf32>
    %67 = vector.shape_cast %66 : vector<2x8xf32> to vector<2x8x1xf32>
    %68 = tpu.reciprocal %67 {approx = true} : vector<2x8x1xf32> -> vector<2x8x1xf32>
    %69 = vector.broadcast %68 : vector<2x8x1xf32> to vector<2x8x8xf32>
    %70 = arith.mulf %65, %69 : vector<2x8x8xf32>
    %71 = arith.truncf %70 : vector<2x8x8xf32> to vector<2x8x8xbf16>
    "tpu.trace_start"() <{level = 10 : i32, message = "bqk,bkd->bqd"}> : () -> ()
    %cst_23 = arith.constant dense<0.000000e+00> : vector<2x8x8xf32>
    %72 = tpu.matmul %71, %59, %cst_23 {dimension_numbers = #tpu.dot_dimension_numbers<[2], [1], [1], [2], [0, 0, 0, 1, 1, 2], [0], [0]>} : vector<2x8x8xbf16>, vector<2x8x8xbf16>, vector<2x8x8xf32> -> vector<2x8x8xf32>
    "tpu.trace_stop"() : () -> ()
    %73 = tpu.concatenate %53, %72 in 2 : vector<2x8x8xf32>, vector<2x8x8xf32> -> vector<2x8x16xf32>
    %74 = vector.shape_cast %73 : vector<2x8x16xf32> to vector<16x16xf32>
    %75 = arith.truncf %74 : vector<16x16xf32> to vector<16x16xbf16>
    %c0_24 = arith.constant 0 : index
    %c0_25 = arith.constant 0 : index
    %c0_26 = arith.constant 0 : index
    %76 = vector.load %arg6[%c0_24, %c0_25, %c0_26] : memref<1x16x32xbf16, #tpu.memory_space<vmem>>, vector<1x16x32xbf16>
    %77 = vector.shape_cast %76 : vector<1x16x32xbf16> to vector<16x32xbf16>
    %cst_27 = arith.constant dense<0.000000e+00> : vector<16x32xf32>
    %78 = tpu.matmul %75, %77, %cst_27 {dimension_numbers = #tpu.dot_dimension_numbers<[1], [0], [0], [1], [0, 0, 1, 1], [], []>} : vector<16x16xbf16>, vector<16x32xbf16>, vector<16x32xf32> -> vector<16x32xf32>
    %c0_28 = arith.constant 0 : index
    %c0_29 = arith.constant 0 : index
    %c0_30 = arith.constant 0 : index
    %79 = vector.load %arg7[%c0_28, %c0_29, %c0_30] : memref<1x1x32xf32, #tpu.memory_space<vmem>>, vector<1x1x32xf32>
    %80 = vector.shape_cast %79 : vector<1x1x32xf32> to vector<1x32xf32>
    %81 = vector.broadcast %80 : vector<1x32xf32> to vector<16x32xf32>
    %82 = arith.addf %78, %81 : vector<16x32xf32>
    %c0_31 = arith.constant 0 : index
    %c0_32 = arith.constant 0 : index
    %c0_33 = arith.constant 0 : index
    %83 = vector.load %arg14[%c0_31, %c0_32, %c0_33] : memref<1x16x32xf32, #tpu.memory_space<vmem>>, vector<1x16x32xf32>
    %84 = vector.shape_cast %83 : vector<1x16x32xf32> to vector<16x32xf32>
    %85 = vector.shape_cast %82 : vector<16x32xf32> to vector<1x16x32xf32>
    tpu.vector_store %arg14[%c0_31, %c0_32, %c0_33], %85 {strides = array<i32>} : memref<1x16x32xf32, #tpu.memory_space<vmem>>, vector<1x16x32xf32>,
    %c0_34 = arith.constant 0 : index
    %c0_35 = arith.constant 0 : index
    %c0_36 = arith.constant 0 : index
    %86 = vector.load %arg8[%c0_34, %c0_35, %c0_36] : memref<1x1x32xf32, #tpu.memory_space<vmem>>, vector<1x1x32xf32>
    %87 = vector.shape_cast %86 : vector<1x1x32xf32> to vector<1x32xf32>
    %c0_37 = arith.constant 0 : index
    %c0_38 = arith.constant 0 : index
    %c0_39 = arith.constant 0 : index
    %88 = vector.load %arg9[%c0_37, %c0_38, %c0_39] : memref<1x1x32xf32, #tpu.memory_space<vmem>>, vector<1x1x32xf32>
    %89 = vector.shape_cast %88 : vector<1x1x32xf32> to vector<1x32xf32>
    %cst_40 = arith.constant dense<0.000000e+00> : vector<16xf32>
    %90 = vector.multi_reduction <add>, %82, %cst_40 [1] : vector<16x32xf32> to vector<16xf32>
    %91 = vector.shape_cast %90 : vector<16xf32> to vector<16x1xf32>
    %cst_41 = arith.constant 3.200000e+01 : f32
    %92 = vector.broadcast %cst_41 : f32 to vector<16x1xf32>
    %93 = arith.divf %91, %92 : vector<16x1xf32>
    %94 = vector.broadcast %93 : vector<16x1xf32> to vector<16x32xf32>
    %95 = arith.subf %82, %94 : vector<16x32xf32>
    %96 = arith.mulf %95, %95 : vector<16x32xf32>
    %cst_42 = arith.constant dense<0.000000e+00> : vector<16xf32>
    %97 = vector.multi_reduction <add>, %96, %cst_42 [1] : vector<16x32xf32> to vector<16xf32>
    %98 = vector.shape_cast %97 : vector<16xf32> to vector<16x1xf32>
    %cst_43 = arith.constant 3.200000e+01 : f32
    %99 = vector.broadcast %cst_43 : f32 to vector<16x1xf32>
    %100 = arith.divf %98, %99 : vector<16x1xf32>
    %101 = vector.broadcast %93 : vector<16x1xf32> to vector<16x32xf32>
    %102 = arith.subf %82, %101 : vector<16x32xf32>
    %cst_44 = arith.constant 9.99999974E-6 : f32
    %103 = vector.broadcast %cst_44 : f32 to vector<16x1xf32>
    %104 = arith.addf %100, %103 : vector<16x1xf32>
    %105 = math.rsqrt %104 : vector<16x1xf32>
    %106 = vector.broadcast %105 : vector<16x1xf32> to vector<16x32xf32>
    %107 = arith.mulf %102, %106 : vector<16x32xf32>
    %108 = vector.broadcast %87 : vector<1x32xf32> to vector<16x32xf32>
    %109 = arith.mulf %107, %108 : vector<16x32xf32>
    %110 = vector.broadcast %89 : vector<1x32xf32> to vector<16x32xf32>
    %111 = arith.addf %109, %110 : vector<16x32xf32>
    %112 = arith.truncf %111 : vector<16x32xf32> to vector<16x32xbf16>
    %c0_45 = arith.constant 0 : index
    %c0_46 = arith.constant 0 : index
    %c0_47 = arith.constant 0 : index
    %113 = vector.load %arg10[%c0_45, %c0_46, %c0_47] : memref<1x32x64xbf16, #tpu.memory_space<vmem>>, vector<1x32x64xbf16>
    %114 = vector.shape_cast %113 : vector<1x32x64xbf16> to vector<32x64xbf16>
    %cst_48 = arith.constant dense<0.000000e+00> : vector<16x64xf32>
    %115 = tpu.matmul %112, %114, %cst_48 {dimension_numbers = #tpu.dot_dimension_numbers<[1], [0], [0], [1], [0, 0, 1, 1], [], []>} : vector<16x32xbf16>, vector<32x64xbf16>, vector<16x64xf32> -> vector<16x64xf32>
    %c0_49 = arith.constant 0 : index
    %c0_50 = arith.constant 0 : index
    %c0_51 = arith.constant 0 : index
    %116 = vector.load %arg11[%c0_49, %c0_50, %c0_51] : memref<1x1x64xf32, #tpu.memory_space<vmem>>, vector<1x1x64xf32>
    %117 = vector.shape_cast %116 : vector<1x1x64xf32> to vector<1x64xf32>
    %118 = vector.broadcast %117 : vector<1x64xf32> to vector<16x64xf32>
    %119 = arith.addf %115, %118 : vector<16x64xf32>
    %cst_52 = arith.constant 5.000000e-01 : f32
    %120 = vector.broadcast %cst_52 : f32 to vector<16x64xf32>
    %121 = arith.mulf %120, %119 : vector<16x64xf32>
    %cst_53 = arith.constant 2.000000e+00 : f32
    %122 = math.sqrt %cst_53 : f32
    %cst_54 = arith.constant 1.000000e+00 : f32
    %123 = arith.divf %cst_54, %122 : f32
    %124 = vector.broadcast %123 : f32 to vector<16x64xf32>
    %125 = arith.mulf %119, %124 : vector<16x64xf32>
    %126 = math.erf %125 : vector<16x64xf32>
    %cst_55 = arith.constant 1.000000e+00 : f32
    %127 = vector.broadcast %cst_55 : f32 to vector<16x64xf32>
    %128 = arith.addf %127, %126 : vector<16x64xf32>
    %129 = arith.mulf %121, %128 : vector<16x64xf32>
    %130 = arith.truncf %129 : vector<16x64xf32> to vector<16x64xbf16>
    %c0_56 = arith.constant 0 : index
    %c0_57 = arith.constant 0 : index
    %c0_58 = arith.constant 0 : index
    %131 = vector.load %arg12[%c0_56, %c0_57, %c0_58] : memref<1x64x32xbf16, #tpu.memory_space<vmem>>, vector<1x64x32xbf16>
    %132 = vector.shape_cast %131 : vector<1x64x32xbf16> to vector<64x32xbf16>
    %cst_59 = arith.constant dense<0.000000e+00> : vector<16x32xf32>
    %133 = tpu.matmul %130, %132, %cst_59 {dimension_numbers = #tpu.dot_dimension_numbers<[1], [0], [0], [1], [0, 0, 1, 1], [], []>} : vector<16x64xbf16>, vector<64x32xbf16>, vector<16x32xf32> -> vector<16x32xf32>
    %c0_60 = arith.constant 0 : index
    %c0_61 = arith.constant 0 : index
    %c0_62 = arith.constant 0 : index
    %134 = vector.load %arg13[%c0_60, %c0_61, %c0_62] : memref<1x1x32xf32, #tpu.memory_space<vmem>>, vector<1x1x32xf32>
    %135 = vector.shape_cast %134 : vector<1x1x32xf32> to vector<1x32xf32>
    %136 = vector.broadcast %135 : vector<1x32xf32> to vector<16x32xf32>
    %137 = arith.addf %133, %136 : vector<16x32xf32>
    %c0_63 = arith.constant 0 : index
    %c0_64 = arith.constant 0 : index
    %c0_65 = arith.constant 0 : index
    %138 = vector.load %arg15[%c0_63, %c0_64, %c0_65] : memref<1x16x32xf32, #tpu.memory_space<vmem>>, vector<1x16x32xf32>
    %139 = vector.shape_cast %138 : vector<1x16x32xf32> to vector<16x32xf32>
    %140 = vector.shape_cast %137 : vector<16x32xf32> to vector<1x16x32xf32>
    tpu.vector_store %arg15[%c0_63, %c0_64, %c0_65], %140 {strides = array<i32>} : memref<1x16x32xf32, #tpu.memory_space<vmem>>, vector<1x16x32xf32>,
    %c0_66 = arith.constant 0 : index
    %c0_67 = arith.constant 0 : index
    %141 = vector.load %arg16[%c0_66, %c0_67] : memref<16x32xf32, #tpu.memory_space<vmem>>, vector<16x32xf32>
    tpu.vector_store %arg16[%c0_66, %c0_67], %137 {strides = array<i32>} : memref<16x32xf32, #tpu.memory_space<vmem>>, vector<16x32xf32>,
    return
  }
  func.func @transform_0(%arg0: i32, %arg1: i32) -> (i32, i32) {
    %c0_i32 = arith.constant 0 : i32
    %c0_i32_0 = arith.constant 0 : i32
    return %arg0, %c0_i32 : i32, i32
  }
  func.func @transform_1(%arg0: i32, %arg1: i32) -> (i32, i32, i32) {
    %c0_i32 = arith.constant 0 : i32
    %c0_i32_0 = arith.constant 0 : i32
    %c0_i32_1 = arith.constant 0 : i32
    return %arg1, %c0_i32, %c0_i32_0 : i32, i32, i32
  }
  func.func @transform_2(%arg0: i32, %arg1: i32) -> (i32, i32, i32) {
    %c0_i32 = arith.constant 0 : i32
    %c0_i32_0 = arith.constant 0 : i32
    %c0_i32_1 = arith.constant 0 : i32
    return %arg1, %c0_i32, %c0_i32_0 : i32, i32, i32
  }
  func.func @transform_3(%arg0: i32, %arg1: i32) -> (i32, i32, i32) {
    %c0_i32 = arith.constant 0 : i32
    %c0_i32_0 = arith.constant 0 : i32
    %c0_i32_1 = arith.constant 0 : i32
    return %arg1, %c0_i32, %c0_i32_0 : i32, i32, i32
  }
  func.func @transform_4(%arg0: i32, %arg1: i32) -> (i32, i32, i32) {
    %c0_i32 = arith.constant 0 : i32
    %c0_i32_0 = arith.constant 0 : i32
    %c0_i32_1 = arith.constant 0 : i32
    return %arg1, %c0_i32, %c0_i32_0 : i32, i32, i32
  }
  func.func @transform_5(%arg0: i32, %arg1: i32) -> (i32, i32, i32) {
    %c0_i32 = arith.constant 0 : i32
    %c0_i32_0 = arith.constant 0 : i32
    %c0_i32_1 = arith.constant 0 : i32
    return %arg1, %c0_i32, %c0_i32_0 : i32, i32, i32
  }
  func.func @transform_6(%arg0: i32, %arg1: i32) -> (i32, i32, i32) {
    %c0_i32 = arith.constant 0 : i32
    %c0_i32_0 = arith.constant 0 : i32
    %c0_i32_1 = arith.constant 0 : i32
    return %arg1, %c0_i32, %c0_i32_0 : i32, i32, i32
  }
  func.func @transform_7(%arg0: i32, %arg1: i32) -> (i32, i32, i32) {
    %c0_i32 = arith.constant 0 : i32
    %c0_i32_0 = arith.constant 0 : i32
    %c0_i32_1 = arith.constant 0 : i32
    return %arg1, %c0_i32, %c0_i32_0 : i32, i32, i32
  }
  func.func @transform_8(%arg0: i32, %arg1: i32) -> (i32, i32, i32) {
    %c0_i32 = arith.constant 0 : i32
    %c0_i32_0 = arith.constant 0 : i32
    %c0_i32_1 = arith.constant 0 : i32
    return %arg1, %c0_i32, %c0_i32_0 : i32, i32, i32
  }
  func.func @transform_9(%arg0: i32, %arg1: i32) -> (i32, i32, i32) {
    %c0_i32 = arith.constant 0 : i32
    %c0_i32_0 = arith.constant 0 : i32
    %c0_i32_1 = arith.constant 0 : i32
    return %arg1, %c0_i32, %c0_i32_0 : i32, i32, i32
  }
  func.func @transform_10(%arg0: i32, %arg1: i32) -> (i32, i32, i32) {
    %c0_i32 = arith.constant 0 : i32
    %c0_i32_0 = arith.constant 0 : i32
    %c0_i32_1 = arith.constant 0 : i32
    return %arg1, %c0_i32, %c0_i32_0 : i32, i32, i32
  }
  func.func @transform_11(%arg0: i32, %arg1: i32) -> (i32, i32, i32) {
    %c0_i32 = arith.constant 0 : i32
    %c0_i32_0 = arith.constant 0 : i32
    %c0_i32_1 = arith.constant 0 : i32
    return %arg1, %c0_i32, %c0_i32_0 : i32, i32, i32
  }
  func.func @transform_12(%arg0: i32, %arg1: i32) -> (i32, i32, i32) {
    %c0_i32 = arith.constant 0 : i32
    %c0_i32_0 = arith.constant 0 : i32
    return %arg1, %arg0, %c0_i32 : i32, i32, i32
  }
  func.func @transform_13(%arg0: i32, %arg1: i32) -> (i32, i32, i32) {
    %c0_i32 = arith.constant 0 : i32
    %c0_i32_0 = arith.constant 0 : i32
    return %arg1, %arg0, %c0_i32 : i32, i32, i32
  }
}

</mosaic_0001>

<bundles_post_ra>
// kernel: tpu_custom_call.1
= control target key start
LH: loop header
LB: loop body
LE: loop exit
PB: predicated region body
PF: predicated region fallthrough
CT: control target
= control target key end

     0   :  { %s3032_s0 = inlined_call_operand.vmem [shape: f32[16,32], index: 0, kind: input, shape index: {}]   ;;  %s3033_s1 = inlined_call_operand.vmem [shape: f32[2,1,32], index: 1, kind: input, shape index: {}]   ;;  %s3034_s2 = inlined_call_operand.vmem [shape: f32[2,1,32], index: 2, kind: input, shape index: {}]   ;;  %s3035_s3 = inlined_call_operand.vmem [shape: bf16[2,32,48], index: 3, kind: input, shape index: {}]   ;;  %s3036_s4 = inlined_call_operand.vmem [shape: bf16[2,16,32], index: 4, kind: input, shape index: {}]   ;;  %s3037_s5 = inlined_call_operand.hbm [shape: f32[2,1,32], index: 5, kind: input, shape index: {}]   ;;  %s3038_s6 = inlined_call_operand.hbm [shape: f32[2,1,32], index: 6, kind: input, shape index: {}]   ;;  %s3039_s7 = inlined_call_operand.hbm [shape: f32[2,1,32], index: 7, kind: input, shape index: {}]   ;;  %s3040_s8 = inlined_call_operand.vmem [shape: bf16[2,32,64], index: 8, kind: input, shape index: {}]   ;;  %s3041_s9 = inlined_call_operand.hbm [shape: f32[2,1,64], index: 9, kind: input, shape index: {}]   ;;  %s3042_s10 = inlined_call_operand.vmem [shape: bf16[2,64,32], index: 10, kind: input, shape index: {}]   ;;  %s3043_s11 = inlined_call_operand.vmem [shape: f32[2,1,32], index: 11, kind: input, shape index: {}]   ;;  %s3044_s12 = inlined_call_operand.hbm [shape: f32[2,16,32], index: 12, kind: output, shape index: {0}]   ;;  %s3045_s13 = inlined_call_operand.hbm [shape: f32[2,16,32], index: 13, kind: output, shape index: {1}]  }
   0x1   :  { %3062 = sst [smem:[#allocation27_spill]] %s3032_s0 }
   0x2   :  { %3063 = sst [smem:[#allocation28_spill]] %s3035_s3 }
   0x3   :  { %3064 = sst [smem:[#allocation29_spill]] %s3038_s6 }
   0x4   :  { %3065 = sst [smem:[#allocation30_spill]] %s3043_s11 }
   0x5   :  { %3066 = sst [smem:[#allocation31_spill]] %s3044_s12 }
   0x6   :  { %3067 = sst [smem:[#allocation32_spill]] %s3045_s13 }
   0x7   :  { %19 = vsyncpa [#allocation4], 0 }
   0x8   :  { %21 = vsyncpa [#allocation4 + $0x1], 0 }
   0x9   :  { %22 = vsyncpa [#allocation7], 0 }
   0xa   :  { %24 = vsyncpa [#allocation7 + $0x1], 0 }
   0xb   :  { %25 = vsyncpa [#allocation10], 0 }
   0xc   :  { %27 = vsyncpa [#allocation10 + $0x1], 0 }
   0xd   :  { %28 = vsyncpa [#allocation5], 0 }
   0xe   :  { %30 = vsyncpa [#allocation5 + $0x1], 0 }
   0xf   :  { %31 = vsyncpa [#allocation13], 0 }
  0x10   :  { %33 = vsyncpa [#allocation13 + $0x1], 0  ;;  %s2514_s25 = smov 0   ;;  %s2516_s26 = smov 0  }
  0x11   :  { %s2518_s27 = smov 0   ;;  %s2520_s28 = smov 0  }
  0x12   :  { %s2522_s29 = smov 0   ;;  %s2524_s30 = smov 0  }
  0x13 LB: > { %3068 = sst [smem:[#allocation19_spill]] %s2407_s25  ;;  %s2545_s14 = sadd.s32 4294967295, %s2427_s30   ;;  %s2427_s30 = sphi %s2524_s30, %s39_s30   ;;  %s2423_s29 = sphi %s2522_s29, %s3113_s29   ;;  %s2419_s28 = sphi %s2520_s28, %s3112_s28   ;;  %s2415_s27 = sphi %s2518_s27, %s3111_s27   ;;  %s2411_s26 = sphi %s2516_s26, %s3115_s26   ;;  %s2407_s25 = sphi %s2514_s25, %s3114_s25  }
  0x14   : > { %3069 = sst [smem:[#allocation20_spill]] %s2415_s27  ;;  %s1875_s15 = sadd.s32 4294967294, %s2427_s30  }
  0x15   : > { %3070 = sst [smem:[#allocation21_spill]] %s2423_s29  ;;  %s48_s16 = sadd.s32 1, %s2423_s29 }
  0x16   : > { %3071 = sst [smem:[#allocation22_spill]] %s2427_s30  ;;  %s188_s17 = sadd.s32 1, %s2415_s27 }
  0x17   : > { %p49_p0 = scmp.ge.s32.totalorder %s48_s16, 2  ;;  %p195_p1 = scmp.ne.s32.totalorder %s2415_s27, %s2411_s26 }
  0x18   : > { %p196_p2 = scmp.eq.s32.totalorder %s2427_s30, 0  ;;  %p201_p3 = scmp.ne.s32.totalorder %s2411_s26, %s2407_s25 }
  0x19   : > { %s3117_s16 = smov (%p49_p0, %s48_s16), 0  ;;  %p202_p5 = scmp.eq.s32.totalorder %s2545_s14, 0 }
  0x1a   : > { %3072 = sst [smem:[#allocation23_spill]] %s3117_s16  ;;  %p2557_p4 = por %p196_p2, %p195_p1 }
  0x1b   : > { %s185_s19 = ssub.s32 %s2423_s29, %s3117_s16  ;;  %p383_p6 = scmp.eq.s32.totalorder %s2545_s14, 1 }
  0x1c   : > { %p186_p7 = scmp.eq.s32.totalorder %s185_s19, 0  ;;  %p2565_p8 = por %p202_p5, %p201_p3 }
  0x1d   : > { %p2569_p9 = por %p383_p6, %p195_p1  ;;  %p389_p10 = scmp.eq.s32.totalorder %s1875_s15, 1 }
  0x1e   : > { %s3074_s20 = scalar_select %p2565_p8, 1, 0 }
  0x1f   : > { %s3075_s21 = scalar_select %p2569_p9, 1, 0 }
  0x20   : > { %s2574_s22 = scalar_select %p186_p7, %s2415_s27, %s188_s17  }
  0x21   : > { %3076 = sst [smem:[#allocation24_spill]] %s3075_s21  ;;  %p2576_p11 = por %p389_p10, %p201_p3 }
  0x22   : > { %3077 = sst [smem:[#allocation25_spill]] %s2574_s22  ;;  %p2084_p13 = scmp.lt.s32.totalorder %s2427_s30, 2 }
  0x23   : > { %s3078_s23 = scalar_select %p2576_p11, 1, 0 }
  0x24   : > { %s2583_s24 = sand.u32 1, %s2415_s27   ;;  %s2586_s19 = sshll.u32 %s2423_s29, 4 }
  0x25   : > { %3079 = sst [smem:[#allocation26_spill]] %s3078_s23  ;;  %s491_s16 = sand.u32 1, %s2427_s30  }
  0x26   : > { %p2591_p0 = pnand %p2084_p13, %p2557_p4  ;;  %s3081_s6 = sld [smem:[#allocation29_spill]] }
  0x27   : > { %s494_s27 = scalar_lea.vmem [#allocation6], %s2583_s24  ;;  %s2605_s18 = scalar_lea.sflag [#allocation7], %s491_s16 }
  0x28   : > { %s3080_s25 = scalar_select %p2591_p0, 1, 0 }
  0x29   : > { %s501_s29 = sshll.u32 %s494_s27, 4  ;;  %p2611_p3 = pneg %p2591_p0  ;;  %s2602_s29 = int_to_ptr.vmem [resolvable:$true] %s501_s29 }
  0x2c   : > { %s2599_s22 = scalar_lea.hbm %s3081_s6, %s2586_s19  ;;  %s2190_s27 = scalar_lea.hbm %s3081_s6, 32 }
  0x2d   : > { %s2185_s23 = scalar_lea.hbm %s2599_s22, 16  ;;  %p2191_p6 = scmp.lt.u32.totalorder %s2599_s22, %s3081_s6 }
  0x2e   : > { %p2186_p2 = scmp.ne.s32.totalorder %s2599_s22, %s2185_s23  ;;  %p2192_p7 = scmp.lt.u32.totalorder %s2190_s27, %s2185_s23 }
  0x2f   : > { %p2194_p13 = scmp.lt.u32.totalorder %s2185_s23, %s2599_s22 }
  0x30   : > { %p2188_p4 = pnand %p2611_p3, %p2186_p2  ;;  %p2193_p10 = por %p2192_p7, %p2191_p6 }
  0x32   : > { %p2189_p5 = pneg %p2188_p4  ;;  %p2195_p12 = por %p2194_p13, %p2193_p10 }
  0x34   : > { %p2196_p1 = pnand %p2195_p12, %p2189_p5 }
  0x36   : > { %2199 = shalt.err (!%p2196_p1)
}
  0x37   : > { %s2200_s16 = scalar_lea.vmem %s2602_s29, 16  ;;  %s2429_s15 = smov [#allocation6]  }
  0x38   : > { %p2201_p2 = scmp.ne.s32.totalorder %s2602_s29, %s2200_s16  ;;  %s2205_s17 = sshll.u32 %s2429_s15, 4  ;;  %s2206_s17 = int_to_ptr.vmem [resolvable:$false] %s2205_s17 }
  0x39   : > { %s2207_s12 = scalar_lea.vmem %s2206_s17, 32  ;;  %p2208_p9 = scmp.lt.s32.totalorder %s2602_s29, %s2206_s17 }
  0x3a   : > { %p2203_p4 = pnand %p2201_p2, %p2611_p3  ;;  %p2209_p8 = scmp.lt.s32.totalorder %s2207_s12, %s2200_s16 }
  0x3c   : > { %p2204_p11 = pneg %p2203_p4  ;;  %p2210_p6 = por %p2209_p8, %p2208_p9 }
  0x3e   : > { %p2211_p7 = pnand %p2210_p6, %p2204_p11 }
  0x40   : > { %2214 = shalt.err (!%p2211_p7)
}
  0x41   : > { %2070 = dma.hbm_to_vmem [thread:$0]  (!%p2591_p0), %s2599_s22, 16, %s2602_s29, %s2605_s18  }
  0x42   : > { %p562_p12 = scmp.lt.s32.totalorder %s2427_s30, 3  ;;  %p3083_p1 = scmp.ge.s32.totalorder %s2427_s30, 1 }
  0x43   : > { %s2646_s16 = scalar_lea.hbm %s3037_s5, %s2586_s19  ;;  %s477_s15 = scalar_lea.vmem [#allocation3], %s2583_s24 }
  0x44   : > { %p2638_p5 = pnand %p3083_p1, %p562_p12  ;;  %s484_s17 = sshll.u32 %s477_s15, 4  ;;  %s485_s17 = int_to_ptr.vmem [resolvable:$true] %s484_s17 }
  0x45   : > { %s475_s12 = scalar_lea.sflag [#allocation4], %s2583_s24  ;;  %s2215_s29 = scalar_lea.hbm %s2646_s16, 16 }
  0x46   : > { %s3084_s21 = scalar_select %p2638_p5, 1, 0 }
  0x47   : > { %p2216_p8 = scmp.ne.s32.totalorder %s2646_s16, %s2215_s29  ;;  %s2220_s30 = scalar_lea.hbm %s3037_s5, 32 }
  0x48   : > { %p2221_p10 = scmp.lt.u32.totalorder %s2646_s16, %s3037_s5  ;;  %p2222_p13 = scmp.lt.u32.totalorder %s2220_s30, %s2215_s29 }
  0x49   : > { %p2218_p9 = pnand %p2216_p8, %p2611_p3  ;;  %p2224_p4 = scmp.lt.u32.totalorder %s2215_s29, %s2646_s16 }
  0x4a   : > { %p2223_p2 = por %p2222_p13, %p2221_p10 }
  0x4b   : > { %p2219_p11 = pneg %p2218_p9 }
  0x4c   : > { %p2225_p6 = por %p2224_p4, %p2223_p2 }
  0x4e   : > { %p2226_p7 = pnand %p2225_p6, %p2219_p11 }
  0x50   : > { %2229 = shalt.err (!%p2226_p7)
}
  0x51   : > { %s2230_s15 = scalar_lea.vmem %s485_s17, 16  ;;  %s2430_s0 = smov [#allocation3]  }
  0x52   : > { %p2231_p12 = scmp.ne.s32.totalorder %s485_s17, %s2230_s15  ;;  %s2235_s11 = sshll.u32 %s2430_s0, 4  ;;  %s2236_s11 = int_to_ptr.vmem [resolvable:$false] %s2235_s11 }
  0x53   : > { %s2237_s6 = scalar_lea.vmem %s2236_s11, 32  ;;  %p2238_p9 = scmp.lt.s32.totalorder %s485_s17, %s2236_s11 }
  0x54   : > { %p2233_p1 = pnand %p2231_p12, %p2611_p3  ;;  %p2239_p5 = scmp.lt.s32.totalorder %s2237_s6, %s2230_s15 }
  0x56   : > { %p2234_p8 = pneg %p2233_p1  ;;  %p2240_p0 = por %p2239_p5, %p2238_p9 }
  0x58   : > { %p2241_p10 = pnand %p2240_p0, %p2234_p8 }
  0x5a   : > { %2244 = shalt.err (!%p2241_p10)
}
  0x5b   : > { %p3085_p13 = scmp.ne.s32.totalorder %s3080_s25, 0  ;;  %s2671_s22 = scalar_lea.hbm %s3039_s7, %s2586_s19 }
  0x5c   : > { %s511_s0 = scalar_lea.vmem [#allocation8], %s2583_s24  ;;  %s2245_s23 = scalar_lea.hbm %s2671_s22, 16 }
  0x5d   : > { %2067 = dma.hbm_to_vmem [thread:$0]  (!%p3085_p13), %s2646_s16, 16, %s485_s17, %s475_s12  }
  0x5e   : > { %s518_s11 = sshll.u32 %s511_s0, 4  ;;  %p2246_p0 = scmp.ne.s32.totalorder %s2671_s22, %s2245_s23  ;;  %s519_s11 = int_to_ptr.vmem [resolvable:$true] %s518_s11 }
  0x5f   : > { %s2250_s16 = scalar_lea.hbm %s3039_s7, 32  ;;  %p2251_p2 = scmp.lt.u32.totalorder %s2671_s22, %s3039_s7 }
  0x60   : > { %p2248_p5 = pnand %p2246_p0, %p2611_p3  ;;  %p2252_p4 = scmp.lt.u32.totalorder %s2250_s16, %s2245_s23 }
  0x61   : > { %p2254_p7 = scmp.lt.u32.totalorder %s2245_s23, %s2671_s22 }
  0x62   : > { %p2249_p11 = pneg %p2248_p5  ;;  %p2253_p6 = por %p2252_p4, %p2251_p2 }
  0x64   : > { %p2255_p12 = por %p2254_p7, %p2253_p6 }
  0x66   : > { %p2256_p1 = pnand %p2255_p12, %p2249_p11 }
  0x68   : > { %2259 = shalt.err (!%p2256_p1)
}
  0x69   : > { %s2260_s6 = scalar_lea.vmem %s519_s11, 16  ;;  %s2431_s30 = smov [#allocation8]  }
  0x6a   : > { %p2261_p8 = scmp.ne.s32.totalorder %s519_s11, %s2260_s6  ;;  %s2265_s29 = sshll.u32 %s2431_s30, 4  ;;  %s2266_s29 = int_to_ptr.vmem [resolvable:$false] %s2265_s29 }
  0x6b   : > { %s2267_s0 = scalar_lea.vmem %s2266_s29, 32  ;;  %p2268_p0 = scmp.lt.s32.totalorder %s519_s11, %s2266_s29 }
  0x6c   : > { %p2263_p9 = pnand %p2261_p8, %p2611_p3  ;;  %p2269_p5 = scmp.lt.s32.totalorder %s2267_s0, %s2260_s6 }
  0x6e   : > { %p2264_p10 = pneg %p2263_p9  ;;  %p2270_p13 = por %p2269_p5, %p2268_p0 }
  0x70   : > { %p2271_p2 = pnand %p2270_p13, %p2264_p10 }
  0x72   : > { %2274 = shalt.err (!%p2271_p2)
}
  0x73   : > { %p3086_p4 = scmp.ne.s32.totalorder %s3080_s25, 0  ;;  %s2696_s15 = scalar_lea.hbm %s3041_s9, %s2586_s19 }
  0x74   : > { %s536_s16 = scalar_lea.vmem [#allocation9], %s2583_s24  ;;  %s534_s12 = scalar_lea.sflag [#allocation10], %s2583_s24 }
  0x75   : > { %2073 = dma.hbm_to_vmem [thread:$0]  (!%p3086_p4), %s2671_s22, 16, %s519_s11, %s2605_s18  }
  0x76   : > { %s543_s17 = sshll.u32 %s536_s16, 4  ;;  %s2275_s6 = scalar_lea.hbm %s2696_s15, 16  ;;  %s544_s17 = int_to_ptr.vmem [resolvable:$true] %s543_s17 }
  0x77   : > { %p2276_p13 = scmp.ne.s32.totalorder %s2696_s15, %s2275_s6  ;;  %s2280_s22 = scalar_lea.hbm %s3041_s9, 32 }
  0x78   : > { %p2281_p7 = scmp.lt.u32.totalorder %s2696_s15, %s3041_s9  ;;  %p2282_p12 = scmp.lt.u32.totalorder %s2280_s22, %s2275_s6 }
  0x79   : > { %p2278_p11 = pnand %p2276_p13, %p2611_p3  ;;  %p2284_p8 = scmp.lt.u32.totalorder %s2275_s6, %s2696_s15 }
  0x7a   : > { %p2283_p1 = por %p2282_p12, %p2281_p7 }
  0x7b   : > { %p2279_p6 = pneg %p2278_p11 }
  0x7c   : > { %p2285_p9 = por %p2284_p8, %p2283_p1 }
  0x7e   : > { %p2286_p10 = pnand %p2285_p9, %p2279_p6 }
  0x80   : > { %2289 = shalt.err (!%p2286_p10)
}
  0x81   : > { %s2290_s24 = scalar_lea.vmem %s544_s17, 16  ;;  %s2432_s29 = smov [#allocation9]  }
  0x82   : > { %p2291_p0 = scmp.ne.s32.totalorder %s544_s17, %s2290_s24  ;;  %s2295_s0 = sshll.u32 %s2432_s29, 4  ;;  %s2296_s0 = int_to_ptr.vmem [resolvable:$false] %s2295_s0 }
  0x83   : > { %s2297_s23 = scalar_lea.vmem %s2296_s0, 32  ;;  %p2298_p13 = scmp.lt.s32.totalorder %s544_s17, %s2296_s0 }
  0x84   : > { %p2293_p5 = pnand %p2291_p0, %p2611_p3  ;;  %p2299_p11 = scmp.lt.s32.totalorder %s2297_s23, %s2290_s24 }
  0x86   : > { %p2294_p2 = pneg %p2293_p5  ;;  %p2300_p4 = por %p2299_p11, %p2298_p13 }
  0x88   : > { %p2301_p7 = pnand %p2300_p4, %p2294_p2 }
  0x8a   : > { %2304 = shalt.err (!%p2301_p7)
}
  0x8b   : > { %p3087_p12 = scmp.ne.s32.totalorder %s3080_s25, 0  ;;  %p3088_p6 = scmp.ne.s32.totalorder %s3084_s21, 0 }
  0x8c   : > { %s2720_s13 = sand.u32 (!%p3088_p6), 1, %s2411_s26   ;;  %p3089_p3 = scmp.ne.s32.totalorder (!%p3088_p6), %s3074_s20, 0 }
  0x8d   : > { %2076 = dma.hbm_to_vmem [thread:$0]  (!%p3087_p12), %s2696_s15, 16, %s544_s17, %s534_s12  }
  0x8e   : > { %566 = sbr.rel (%p3088_p6) target bundleno = 3235 (0xca3), region = 68  ;;  %s569_s27 = scalar_lea.sflag (!%p3088_p6), [#allocation4], %s2720_s13 }
  0x95   : > { %2386 = dma.done.wait (%p3089_p3), %s569_s27, 16  }
  0x96   : > { %2388 = vsyncadd (%p3089_p3), %s569_s27, 4294967280  ;;  %s576_s25 = sand.u32 1, %s2545_s14  }
  0x97   : > { %s577_s15 = scalar_lea.sflag [#allocation7], %s576_s25 }
  0x98   : > { %2390 = dma.done.wait (%p3089_p3), %s577_s15, 32  }
  0x99   : > { %2392 = vsyncadd (%p3089_p3), %s577_s15, 4294967264  ;;  %s593_s12 = scalar_lea.sflag [#allocation10], %s2720_s13 }
  0x9a   : > { %2394 = dma.done.wait (%p3089_p3), %s593_s12, 16  }
  0x9b   : > { %2396 = vsyncadd (%p3089_p3), %s593_s12, 4294967280  ;;  %s1884_s14 = sshll.u32 %s2720_s13, 4  ;;  %p694_p4 = scmp.lt.s32.totalorder %s2419_s28, 1 }
  0x9c   : > { %s3090_s3 = sld [smem:[#allocation28_spill]]  ;;  %s3091_s27 = sld [smem:[#allocation30_spill]] }
  0x9d   : > { %s2744_s30 = scalar_select %p694_p4, %s2419_s28, 1 }
  0x9e   : > { %s2783_s15 = scalar_lea.vmem [#allocation12], %s1884_s14  ;;  %p1894_p1 = scmp.ne.s32.totalorder %s2419_s28, 0 }
  0x9f   : > { %s1933_s29 = sshll.u32 %s2744_s30, 4  ;;  %s1934_s0 = sshll.u32 %s2744_s30, 3  ;;  %vm732_vm0 = vcmask (!%p1894_p1), 261120  }
  0xa0   : > { %s2764_s18 = scalar_lea.vmem %s3036_s4, %s1934_s0  ;;  %s2769_s17 = scalar_lea.vmem %s3040_s8, %s1933_s29 }
  0xa1   : > { %s1936_s21 = sshll.u32 %s2744_s30, 5  ;;  %729 = sbr.rel (%p1894_p1) target bundleno = 172 (0xac), region = 88 }
  0xa2   : > { %s2759_s25 = scalar_lea.vmem %s3090_s3, %s1933_s29  ;;  %s2775_s16 = scalar_lea.vmem %s3042_s10, %s1936_s21 }
  0xa3   : > { %s722_s11 = scalar_lea.vmem %s3091_s27, %s2744_s30  ;;  %s2781_s3 = scalar_lea.vmem [#allocation11], %s1884_s14 }
  0xa4   : > { %s3092_s0 = sld [smem:[#allocation27_spill]] (!%p1894_p1) }
  0xaa   : > { %v730_v0 = vld [vmem:[%s3092_s0] sm:$0xff]  ;;  %v731_v1 = vld [vmem:[%s3092_s0 + $0x8] sm:$0xff] }
  0xab   : > { %733 = vst.msk [vmem:[#allocation2] sm:$0xff] %vm732_vm0, %v730_v0  ;;  %734 = vst.msk [vmem:[#allocation2 + $0x8] sm:$0xff] %vm732_vm0, %v731_v1 }
  0xac PF: > { %vm739_vm1 = vcmask 261120   ;;  %v2148_v16 = vld [vmem:[%s2759_s25] sm:$0xff]   ;;  %v2433_v17 = vmov 0.0   ;;  %v2149_v18 = vld [vmem:[%s2759_s25 + $0x8] sm:$0xff]   ;;  %vm2434_vm2 = vmmov 0   ;;  %s3093_s24 = scalar_lea.vmem %s3033_s1, %s2744_s30  ;;  %s3094_s20 = scalar_lea.vmem %s3034_s2, %s2744_s30  ;;  %vm852_vm3 = vcmask 64512  }
  0xad   : > { %1970 = vmatprep.subr.bf16.mxu0 %v2433_v17  ;;  %1978 = vmatprep.subr.bf16.mxu1 %v2433_v17  ;;  %v1895_v27 = vld [vmem:[%s3093_s24] ss:$0 sm:$0xff]  ;;  %s2435_s23 = smov 112   ;;  %s2436_s27 = smov 96   ;;  %vm976_vm4 = vcmask 1043456   ;;  %vm1314_vm5 = vcmask 130048  }
  0xae   : > { %1971 = vmatpush3.bf16.msra.mxu0 %v2148_v16  ;;  %1974 = vmatprep.mubr.msk.bf16.mxu0 %vm2434_vm2, %v2433_v17  ;;  %v1896_v31 = vld [vmem:[%s3094_s20] ss:$0 sm:$0xff]  ;;  %s2437_s6 = smov 104   ;;  %s2438_s29 = smov 120   ;;  %vm1523_vm6 = vcmask 523264  }
  0xaf   : > { %1972 = vmatprep.subr.bf16.mxu0 %v2433_v17  ;;  %1980 = vmatprep.mubr.msk.bf16.mxu1 %vm2434_vm2, %v2433_v17  ;;  %s2439_s12 = smov 88   ;;  %s2440_s22 = smov 8  }
  0xb0   : > { %s3096_s21 = scalar_lea.vmem [#allocation6], %s2720_s13  ;;  %s3098_s14 = scalar_lea.vmem [#allocation9], %s2720_s13 }
  0xb1   : > { %s1939_s24 = sshll.u32 %s2419_s28, 8  ;;  %s3100_s20 = sld [smem:[#allocation31_spill]] }
  0xb2   : > { %v735_v2 = vld [vmem:[#allocation2] sm:$0xff]  ;;  %v736_v3 = vld [vmem:[#allocation2 + $0x8] sm:$0xff]  ;;  %1973 = vmatpush3.bf16.msra.mxu0 %v2149_v18 }
  0xb3   : > { %v740_v4 = vsel %vm739_vm1, %v735_v2, 0.0  ;;  %v743_v5 = vsel %vm739_vm1, %v736_v3, 0.0  ;;  %1984 = vmatprep.subr.bf16.mxu0 %v2433_v17 }
  0xb4   : > { %741 = vadd.xlane.f32.xlu0 %v740_v4 }
  0xb8   : > { %744 = vadd.xlane.f32.xlu0 %v743_v5 }
 0x141   : > { %v742_v6 = vpop.xlane.xlu0 %741 }
 0x142   : > { %v747_v7 = vmul.f32 0.03125, %v742_v6 }
 0x144   : > { %v749_v8 = vsub.f32 %v735_v2, %v747_v7 }
 0x145   : > { %v745_v9 = vpop.xlane.xlu0 %744 }
 0x146   : > { %v748_v10 = vmul.f32 0.03125, %v745_v9  ;;  %v751_v11 = vmul.f32 %v749_v8, %v749_v8 }
 0x148   : > { %v750_v12 = vsub.f32 %v736_v3, %v748_v10  ;;  %v753_v13 = vsel %vm739_vm1, %v751_v11, 0.0 }
 0x149   : > { %754 = vadd.xlane.f32.xlu1 %v753_v13 }
 0x14a   : > { %v752_v14 = vmul.f32 %v750_v12, %v750_v12 }
 0x14c   : > { %v756_v15 = vsel %vm739_vm1, %v752_v14, 0.0 }
 0x14d   : > { %757 = vadd.xlane.f32.xlu1 %v756_v15 }
 0x1d6   : > { %v755_v19 = vpop.xlane.xlu1 %754 }
 0x1d7   : > { %v759_v20 = vmul.f32 0.03125, %v755_v19 }
 0x1d9   : > { %v761_v21 = vadd.f32 1e-05, %v759_v20 }
 0x1da   : > { %v758_v22 = vpop.xlane.xlu1 %757 }
 0x1db   : > { %2157 = vrsqrt.f32 %v761_v21  ;;  %v760_v23 = vmul.f32 0.03125, %v758_v22 }
 0x1dd   : > { %v762_v24 = vadd.f32 1e-05, %v760_v23 }
 0x1df   : > { %2159 = vrsqrt.f32 %v762_v24 }
 0x1e5   : > { %v2158_v25 = vpop.eup %2157 }
 0x1e6   : > { %v765_v26 = vmul.f32 %v2158_v25, %v749_v8 }
 0x1e8   : > { %v773_v30 = vmul.f32 %v1895_v27, %v765_v26 }
 0x1e9   : > { %v2160_v28 = vpop.eup %2159 }
 0x1ea   : > { %v766_v29 = vmul.f32 %v2160_v28, %v750_v12  ;;  %v781_v33 = vadd.f32 %v1896_v31, %v773_v30 }
 0x1ec   : > { %v774_v32 = vmul.f32 %v1895_v27, %v766_v29 }
 0x1ee   : > { %v782_v34 = vadd.f32 %v1896_v31, %v774_v32 }
 0x1f0   : > { %v783_v35 = vpack.c.bf16 %v782_v34, %v781_v33 }
 0x1f2   : > { %1975 = vmatmul.mubr.msk.bf16.vlgmr.msra.gmra.mrb[0].mxu0 %vm739_vm1, %v783_v35 }
 0x1f3   : > { %1986 = vmatprep.mubr.msk.bf16.mxu0 %vm2434_vm2, %v2433_v17 }
 0x2c5   : > { %v837_v36 = vpop.f32.mrb[0].mxu0 }
 0x2c6   : > { %v2819_v37 = vpack.c.bf16 %v837_v36, %v837_v36  ;;  %v1976_v38 = vpop.f32.mrb[1].mxu0 }
 0x2c7   : > { %v840_v39 = vpop.f32.mrb[2].mxu0 }
 0x2c8   : > { %v2821_v40 = vpack.c.bf16 %v840_v39, %v840_v39  ;;  %850 = vrot.lane.b32.xlu0 %v2819_v37, %s2435_s23  ;;  %v1977_v41 = vpop.f32.mrb[3].mxu0 }
 0x2ca   : > { %899 = vrot.lane.b32.xlu1 %v2821_v40, %s2435_s23  ;;  %s2929_s23 = scalar_lea.hbm %s3100_s20, %s1939_s24 }
 0x33a   : > { %v851_v42 = vpop.permute.xlu0 %850 }
 0x33b   : > { %v857_v43 = vsel %vm852_vm3, %v851_v42, 0 }
 0x33c   : > { %1979 = vmatpush3.bf16.xpose.msra.mxu1 %v857_v43  ;;  %v900_v44 = vpop.permute.xlu1 %899 }
 0x33d   : > { %v905_v45 = vsel %vm852_vm3, %v900_v44, 0  ;;  %1990 = vmatprep.subr.bf16.mxu1 %v2433_v17 }
 0x33e   : > { %1985 = vmatpush3.bf16.xpose.msra.mxu0 %v905_v45 }
 0x33f   : > { %1996 = vmatprep.subr.bf16.mxu0 %v2433_v17 }
 0x343   : > { %1981 = vmatmul.mubr.msk.bf16.vlgmr.msra.gmra.mrb[0].mxu1 %vm852_vm3, %v2819_v37 }
 0x344   : > { %1992 = vmatprep.mubr.msk.bf16.mxu1 %vm2434_vm2, %v2433_v17 }
 0x345   : > { %1987 = vmatmul.mubr.msk.bf16.vlgmr.msra.gmra.mrb[4].mxu0 %vm852_vm3, %v2821_v40 }
 0x346   : > { %1998 = vmatprep.mubr.msk.bf16.mxu0 %vm2434_vm2, %v2433_v17 }
 0x416   : > { %v893_v46 = vpop.f32.mrb[0].mxu1 }
 0x417   : > { %v1982_v47 = vpop.f32.mrb[1].mxu1  ;;  %v947_v48 = vsel %vm852_vm3, %v893_v46, -inf }
 0x418   : > { %v896_v49 = vpop.f32.mrb[2].mxu1  ;;  %948 = vmax.xlane.f32.xlu1 %v947_v48  ;;  %v941_v50 = vpop.f32.mrb[4].mxu0 }
 0x419   : > { %v1983_v51 = vpop.f32.mrb[3].mxu1  ;;  %v1988_v52 = vpop.f32.mrb[5].mxu0  ;;  %v950_v53 = vsel %vm852_vm3, %v941_v50, -inf }
 0x41a   : > { %951 = vmax.xlane.f32.xlu0 %v950_v53  ;;  %v944_v54 = vpop.f32.mrb[6].mxu0 }
 0x41b   : > { %v1989_v55 = vpop.f32.mrb[7].mxu0 }
 0x429   : > { %1020 = vrot.lane.b32.xlu1 %v2821_v40, %s2436_s27 }
 0x42d   : > { %1070 = vrot.lane.b32.xlu1 %v2819_v37, %s2437_s6 }
 0x4a5   : > { %v949_v56 = vpop.xlane.xlu1 %948 }
 0x4a6   : > { %v953_v57 = vsub.f32 %v893_v46, %v949_v56 }
 0x4a7   : > { %v952_v58 = vpop.xlane.xlu0 %951 }
 0x4a8   : > { %v955_v59 = vmul.f32 1.442695, %v953_v57  ;;  %v954_v60 = vsub.f32 %v941_v50, %v952_v58 }
 0x4a9   : > { %v1021_v61 = vpop.permute.xlu1 %1020 }
 0x4aa   : > { %2161 = vpow2.f32 %v955_v59  ;;  %v957_v62 = vmul.f32 1.442695, %v954_v60  ;;  %v1026_v63 = vsel %vm976_vm4, %v1021_v61, 0  ;;  %v2150_v61 = vld [vmem:[%s2764_s18] sm:$0xff]   ;;  %s3095_s18 = scalar_lea.vmem [#allocation3], %s2720_s13 }
 0x4ab   : > { %1997 = vmatpush3.bf16.msra.mxu0 %v1026_v63 }
 0x4ac   : > { %2163 = vpow2.f32 %v957_v62  ;;  %2008 = vmatprep.subr.bf16.mxu0 %v2433_v17 }
 0x4ad   : > { %v1071_v4 = vpop.permute.xlu1 %1070 }
 0x4ae   : > { %v1076_v15 = vsel %vm852_vm3, %v1071_v4, 0 }
 0x4b4   : > { %v2162_v0 = vpop.eup %2161 }
 0x4b5   : > { %v959_v1 = vsel %vm852_vm3, %v2162_v0, 0.0 }
 0x4b6   : > { %v2164_v2 = vpop.eup %2163  ;;  %960 = vadd.xlane.f32.xlu0 %v959_v1 }
 0x4b7   : > { %v962_v3 = vsel %vm852_vm3, %v2164_v2, 0.0 }
 0x4b8   : > { %963 = vadd.xlane.f32.xlu1 %v962_v3 }
 0x4c9   : > { %1120 = vrot.lane.b32.xlu1 %v2821_v40, %s2437_s6  ;;  %s1573_s6 = scalar_lea.sflag [#allocation5], %s2720_s13 }
 0x4cc   : > { %971 = vrot.lane.b32.xlu0 %v2819_v37, %s2436_s27  ;;  %s1593_s27 = sshll.u32 %s2781_s3, 4  ;;  %s2932_s27 = int_to_ptr.vmem [resolvable:$true] %s1593_s27 }
 0x4cd   : > { %1118 = vrot.lane.b32.xlu1 %v2821_v40, %s2438_s29 }
 0x4d0   : > { %1068 = vrot.lane.b32.xlu0 %v2819_v37, %s2438_s29  ;;  %s2305_s29 = scalar_lea.vmem %s2932_s27, 256 }
 0x4d1   : > { %p2306_p8 = scmp.ne.s32.totalorder %s2932_s27, %s2305_s29 }
 0x543   : > { %v961_v5 = vpop.xlane.xlu0 %960 }
 0x544   : > { %2165 = vrcp.f32 %v961_v5 }
 0x545   : > { %v964_v6 = vpop.xlane.xlu1 %963 }
 0x546   : > { %2167 = vrcp.f32 %v964_v6 }
 0x547   : > { %v972_v7 = vpop.permute.xlu0 %971 }
 0x548   : > { %v978_v8 = vsel %vm976_vm4, %v972_v7, 0 }
 0x549   : > { %1991 = vmatpush3.bf16.msra.mxu1 %v978_v8  ;;  %v1121_v14 = vpop.permute.xlu1 %1120 }
 0x54a   : > { %2002 = vmatprep.subr.bf16.mxu1 %v2433_v17  ;;  %v1126_v18 = vsel %vm852_vm3, %v1121_v14, 0 }
 0x54b   : > { %v1069_v19 = vpop.permute.xlu0 %1068 }
 0x54d   : > { %v1119_v20 = vpop.permute.xlu1 %1118 }
 0x54e   : > { %v2166_v9 = vpop.eup %2165 }
 0x54f   : > { %v967_v10 = vmul.f32 %v2166_v9, %v2162_v0 }
 0x550   : > { %v2168_v11 = vpop.eup %2167 }
 0x551   : > { %v968_v12 = vmul.f32 %v2168_v11, %v2164_v2  ;;  %v969_v13 = vpack.c.bf16 %v967_v10, %v967_v10 }
 0x553   : > { %1993 = vmatmul.mubr.msk.bf16.vlgmr.msra.gmra.mrb[4].mxu1 %vm852_vm3, %v969_v13  ;;  %v970_v16 = vpack.c.bf16 %v968_v12, %v968_v12  ;;  %v1910_v13 = vld [vmem:[%s3095_s18] ss:$0 sm:$0xff] }
 0x554   : > { %2003 = vmatpush3.bf16.xpose.msra.mxu1 %v1076_v15  ;;  %2004 = vmatprep.mubr.msk.bf16.mxu1 %vm2434_vm2, %v2433_v17 }
 0x555   : > { %1999 = vmatmul.mubr.msk.bf16.vlgmr.msra.gmra.mrb[8].mxu0 %vm852_vm3, %v970_v16  ;;  %2014 = vmatprep.subr.bf16.mxu1 %v2433_v17 }
 0x556   : > { %2009 = vmatpush3.bf16.xpose.msra.mxu0 %v1126_v18  ;;  %2010 = vmatprep.mubr.msk.bf16.mxu0 %vm2434_vm2, %v2433_v17 }
 0x557   : > { %2020 = vmatprep.subr.bf16.mxu0 %v2433_v17 }
 0x55b   : > { %2005 = vmatmul.mubr.msk.bf16.vlgmr.msra.gmra.mrb[8].mxu1 %vm852_vm3, %v1069_v19 }
 0x55c   : > { %2016 = vmatprep.mubr.msk.bf16.mxu1 %vm2434_vm2, %v2433_v17 }
 0x55d   : > { %2011 = vmatmul.mubr.msk.bf16.vlgmr.msra.gmra.mrb[12].mxu0 %vm852_vm3, %v1119_v20 }
 0x55e   : > { %2022 = vmatprep.mubr.msk.bf16.mxu0 %vm2434_vm2, %v2433_v17 }
 0x626   : > { %v2867_v21 = vpop.f32.mrb[4].mxu1 }
 0x627   : > { %v1994_v22 = vpop.f32.mrb[5].mxu1 }
 0x628   : > { %v1017_v23 = vpop.f32.mrb[6].mxu1  ;;  %v2869_v24 = vpop.f32.mrb[8].mxu0 }
 0x629   : > { %v1995_v25 = vpop.f32.mrb[7].mxu1  ;;  %v2000_v26 = vpop.f32.mrb[9].mxu0 }
 0x62a   : > { %v1065_v27 = vpop.f32.mrb[10].mxu0 }
 0x62b   : > { %v2001_v28 = vpop.f32.mrb[11].mxu0 }
 0x62e   : > { %v1112_v29 = vpop.f32.mrb[8].mxu1 }
 0x62f   : > { %v2006_v30 = vpop.f32.mrb[9].mxu1  ;;  %v1168_v31 = vsel %vm852_vm3, %v1112_v29, -inf }
 0x630   : > { %1169 = vmax.xlane.f32.xlu0 %v1168_v31  ;;  %v1115_v32 = vpop.f32.mrb[10].mxu1  ;;  %v1162_v33 = vpop.f32.mrb[12].mxu0 }
 0x631   : > { %v2007_v34 = vpop.f32.mrb[11].mxu1  ;;  %v2012_v35 = vpop.f32.mrb[13].mxu0  ;;  %v1171_v36 = vsel %vm852_vm3, %v1162_v33, -inf }
 0x632   : > { %1172 = vmax.xlane.f32.xlu1 %v1171_v36  ;;  %v1165_v38 = vpop.f32.mrb[14].mxu0  ;;  %v2152_v34 = vld [vmem:[%s2769_s17 + $0x8] sm:$0xff]  }
 0x633   : > { %v2013_v39 = vpop.f32.mrb[15].mxu0 }
 0x643   : > { %1240 = vrot.lane.b32.xlu1 %v2821_v40, %s2439_s12 }
 0x6bd   : > { %v1170_v41 = vpop.xlane.xlu0 %1169 }
 0x6be   : > { %v1174_v42 = vsub.f32 %v1112_v29, %v1170_v41 }
 0x6bf   : > { %v1173_v43 = vpop.xlane.xlu1 %1172 }
 0x6c0   : > { %v1176_v44 = vmul.f32 1.442695, %v1174_v42  ;;  %v1175_v45 = vsub.f32 %v1162_v33, %v1173_v43  ;;  %v2151_v33 = vld [vmem:[%s2769_s17] sm:$0xff]   ;;  %s3097_s17 = scalar_lea.vmem [#allocation8], %s2720_s13 }
 0x6c2   : > { %2169 = vpow2.f32 %v1176_v44  ;;  %v1178_v46 = vmul.f32 1.442695, %v1175_v45  ;;  %v1913_v45 = vld [vmem:[%s3096_s21] ss:$0 sm:$0xff] }
 0x6c3   : > { %v1241_v47 = vpop.permute.xlu1 %1240 }
 0x6c4   : > { %2171 = vpow2.f32 %v1178_v46  ;;  %v1246_v48 = vsel %vm976_vm4, %v1241_v47, 0 }
 0x6c5   : > { %2021 = vmatpush3.bf16.msra.mxu0 %v1246_v48 }
 0x6c6   : > { %2032 = vmatprep.subr.bf16.mxu0 %v2433_v17 }
 0x6cc   : > { %v2170_v49 = vpop.eup %2169 }
 0x6cd   : > { %v1180_v50 = vsel %vm852_vm3, %v2170_v49, 0.0 }
 0x6ce   : > { %v2172_v51 = vpop.eup %2171  ;;  %1181 = vadd.xlane.f32.xlu0 %v1180_v50 }
 0x6cf   : > { %v1183_v40 = vsel %vm852_vm3, %v2172_v51, 0.0 }
 0x6d2   : > { %1184 = vadd.xlane.f32.xlu0 %v1183_v40 }
 0x6e8   : > { %1192 = vrot.lane.b32.xlu0 %v2819_v37, %s2439_s12  ;;  %s2441_s12 = smov [#allocation11]  }
 0x6e9   : > { %s2309_s18 = sshll.u32 %s2441_s12, 4  ;;  %s2310_s18 = int_to_ptr.vmem [resolvable:$false] %s2309_s18 }
 0x6ea   : > { %s2311_s21 = scalar_lea.vmem %s2310_s18, 512  ;;  %p2312_p5 = scmp.lt.s32.totalorder %s2932_s27, %s2310_s18 }
 0x6eb   : > { %p2313_p2 = scmp.lt.s32.totalorder %s2311_s21, %s2305_s29 }
 0x6ed   : > { %p2314_p13 = por %p2313_p2, %p2312_p5 }
 0x75b   : > { %v1182_v52 = vpop.xlane.xlu0 %1181 }
 0x75c   : > { %2173 = vrcp.f32 %v1182_v52 }
 0x75f   : > { %v1185_v53 = vpop.xlane.xlu0 %1184 }
 0x760   : > { %2175 = vrcp.f32 %v1185_v53  ;;  %v2153_v53 = vld [vmem:[%s2775_s16] sm:$0xff]  }
 0x763   : > { %v1193_v54 = vpop.permute.xlu0 %1192 }
 0x764   : > { %v1198_v55 = vsel %vm976_vm4, %v1193_v54, 0  ;;  %v2154_v54 = vld [vmem:[%s2775_s16 + $0x8] sm:$0xff]  }
 0x765   : > { %2015 = vmatpush3.bf16.msra.mxu1 %v1198_v55  ;;  %v2155_v55 = vld [vmem:[%s2775_s16 + $0x10] sm:$0xff]  }
 0x766   : > { %v2174_v56 = vpop.eup %2173  ;;  %2026 = vmatprep.subr.bf16.mxu1 %v2433_v17 }
 0x767   : > { %v1188_v57 = vmul.f32 %v2174_v56, %v2170_v49  ;;  %v1914_v49 = vld [vmem:[%s3097_s17] ss:$0 sm:$0xff]  ;;  %v2156_v56 = vld [vmem:[%s2775_s16 + $0x18] sm:$0xff]   ;;  %s3099_s16 = sld [smem:[#allocation24_spill]] }
 0x769   : > { %v1190_v58 = vpack.c.bf16 %v1188_v57, %v1188_v57  ;;  %v1915_v57 = vld [vmem:[%s3098_s14] ss:$0 sm:$0xff] }
 0x76a   : > { %v2176_v59 = vpop.eup %2175 }
 0x76b   : > { %v1189_v60 = vmul.f32 %v2176_v59, %v2172_v51  ;;  %2017 = vmatmul.mubr.msk.bf16.vlgmr.msra.gmra.mrb[12].mxu1 %vm852_vm3, %v1190_v58 }
 0x76c   : > { %2028 = vmatprep.mubr.msk.bf16.mxu1 %vm2434_vm2, %v2433_v17  ;;  %2027 = vmatpush3.bf16.msra.mxu1 %v2150_v61 }
 0x76d   : > { %v1191_v37 = vpack.c.bf16 %v1189_v60, %v1189_v60  ;;  %2040 = vmatprep.subr.bf16.mxu1 %v2433_v17  ;;  %p3101_p9 = scmp.ne.s32.totalorder %s3099_s16, 0 }
 0x76f   : > { %2023 = vmatmul.mubr.msk.bf16.vlgmr.msra.gmra.mrb[16].mxu0 %vm852_vm3, %v1191_v37  ;;  %p2307_p10 = pnand %p2306_p8, %p3101_p9 }
 0x770   : > { %2036 = vmatprep.mubr.msk.bf16.mxu0 %vm2434_vm2, %v2433_v17  ;;  %2033 = vmatpush3.bf16.msra.mxu0 %v2151_v33 }
 0x771   : > { %2034 = vmatprep.subr.bf16.mxu0 %v2433_v17  ;;  %p2308_p0 = pneg %p2307_p10 }
 0x773   : > { %p2315_p11 = pnand %p2314_p13, %p2308_p0 }
 0x774   : > { %2035 = vmatpush3.bf16.msra.mxu0 %v2152_v34 }
 0x83e   : > { %v1234_v62 = vpop.f32.mrb[12].mxu1 }
 0x83f   : > { %v2018_v63 = vpop.f32.mrb[13].mxu1 }
 0x840   : > { %v1237_v0 = vpop.f32.mrb[14].mxu1 }
 0x841   : > { %v2019_v1 = vpop.f32.mrb[15].mxu1 }
 0x842   : > { %v1282_v2 = vpop.f32.mrb[16].mxu0 }
 0x843   : > { %v2143_v3 = vpack.i.bf16 %v1282_v2, %v1234_v62  ;;  %v2024_v4 = vpop.f32.mrb[17].mxu0 }
 0x844   : > { %v1285_v5 = vpop.f32.mrb[18].mxu0 }
 0x845   : > { %2144 = vrot.lane.b32.xlu1 %v2143_v3, %s2440_s22  ;;  %v2025_v6 = vpop.f32.mrb[19].mxu0 }
 0x8b7   : > { %v2145_v7 = vpop.permute.xlu1 %2144 }
 0x8b8   : > { %v2147_v8 = vunpack.i.h.bf16 %v2145_v7  ;;  %v2146_v9 = vunpack.i.l.bf16 %v2145_v7 }
 0x8ba   : > { %v1297_v10 = vsel %vm852_vm3, %v2869_v24, %v2147_v8  ;;  %v1296_v11 = vsel %vm852_vm3, %v2867_v21, %v2146_v9 }
 0x8bb   : > { %v1298_v12 = vpack.c.bf16 %v1297_v10, %v1296_v11 }
 0x8bd   : > { %2029 = vmatmul.mubr.msk.bf16.vlgmr.msra.gmra.mrb[16].mxu1 %vm1314_vm5, %v1298_v12 }
 0x8be   : > { %2048 = vmatprep.mubr.msk.bf16.mxu1 %vm2434_vm2, %v2433_v17  ;;  %2041 = vmatpush3.bf16.msra.mxu1 %v2153_v53 }
 0x8bf   : > { %2042 = vmatprep.subr.bf16.mxu1 %v2433_v17 }
 0x8c2   : > { %2043 = vmatpush3.bf16.msra.mxu1 %v2154_v54 }
 0x8c3   : > { %2044 = vmatprep.subr.bf16.mxu1 %v2433_v17 }
 0x8c6   : > { %2045 = vmatpush3.bf16.msra.mxu1 %v2155_v55 }
 0x8c7   : > { %2046 = vmatprep.subr.bf16.mxu1 %v2433_v17 }
 0x8ca   : > { %2047 = vmatpush3.bf16.msra.mxu1 %v2156_v56 }
 0x990   : > { %v1352_v14 = vpop.f32.mrb[16].mxu1 }
 0x991   : > { %v1353_v15 = vadd.f32 %v1910_v13, %v1352_v14  ;;  %v2030_v16 = vpop.f32.mrb[17].mxu1 }
 0x992   : > { %v1355_v18 = vpop.f32.mrb[18].mxu1 }
 0x993   : > { %1359 = vst.msk [vmem:[%s2781_s3] sm:$0xff] %vm739_vm1, %v1353_v15  ;;  %v1356_v19 = vadd.f32 %v1910_v13, %v1355_v18  ;;  %v2031_v20 = vpop.f32.mrb[19].mxu1  ;;  %v1363_v22 = vsel %vm739_vm1, %v1353_v15, 0.0 }
 0x994   : > { %1364 = vadd.xlane.f32.xlu1 %v1363_v22 }
 0x995   : > { %1360 = vst.msk [vmem:[%s2781_s3 + $0x8] sm:$0xff] %vm739_vm1, %v1356_v19  ;;  %v1366_v21 = vsel %vm739_vm1, %v1356_v19, 0.0 }
 0x996   : > { %1367 = vadd.xlane.f32.xlu0 %v1366_v21 }
 0xa21   : > { %v1365_v23 = vpop.xlane.xlu1 %1364 }
 0xa22   : > { %v1369_v24 = vmul.f32 0.03125, %v1365_v23 }
 0xa23   : > { %v1368_v25 = vpop.xlane.xlu0 %1367 }
 0xa24   : > { %v1371_v26 = vsub.f32 %v1353_v15, %v1369_v24  ;;  %v1370_v27 = vmul.f32 0.03125, %v1368_v25 }
 0xa26   : > { %v1372_v28 = vsub.f32 %v1356_v19, %v1370_v27  ;;  %v1373_v29 = vmul.f32 %v1371_v26, %v1371_v26 }
 0xa28   : > { %v1375_v30 = vsel %vm739_vm1, %v1373_v29, 0.0  ;;  %v1374_v31 = vmul.f32 %v1372_v28, %v1372_v28 }
 0xa29   : > { %1376 = vadd.xlane.f32.xlu0 %v1375_v30 }
 0xa2a   : > { %v1378_v32 = vsel %vm739_vm1, %v1374_v31, 0.0 }
 0xa2d   : > { %1379 = vadd.xlane.f32.xlu0 %v1378_v32 }
 0xab6   : > { %v1377_v35 = vpop.xlane.xlu0 %1376 }
 0xab7   : > { %v1381_v36 = vmul.f32 0.03125, %v1377_v35 }
 0xab9   : > { %v1383_v38 = vadd.f32 1e-05, %v1381_v36 }
 0xaba   : > { %v1380_v39 = vpop.xlane.xlu0 %1379 }
 0xabb   : > { %2177 = vrsqrt.f32 %v1383_v38  ;;  %v1382_v41 = vmul.f32 0.03125, %v1380_v39 }
 0xabd   : > { %v1384_v42 = vadd.f32 1e-05, %v1382_v41 }
 0xabf   : > { %2179 = vrsqrt.f32 %v1384_v42 }
 0xac5   : > { %v2178_v43 = vpop.eup %2177 }
 0xac6   : > { %v1387_v44 = vmul.f32 %v2178_v43, %v1371_v26 }
 0xac8   : > { %v1395_v47 = vmul.f32 %v1913_v45, %v1387_v44 }
 0xac9   : > { %v2180_v46 = vpop.eup %2179 }
 0xaca   : > { %v1388_v48 = vmul.f32 %v2180_v46, %v1372_v28  ;;  %v1403_v51 = vadd.f32 %v1914_v49, %v1395_v47 }
 0xacc   : > { %v1396_v50 = vmul.f32 %v1913_v45, %v1388_v48 }
 0xace   : > { %v1404_v40 = vadd.f32 %v1914_v49, %v1396_v50 }
 0xad0   : > { %v1405_v52 = vpack.c.bf16 %v1404_v40, %v1403_v51 }
 0xad2   : > { %2037 = vmatmul.mubr.msk.bf16.vlgmr.msra.gmra.mrb[20].mxu0 %vm739_vm1, %v1405_v52 }
 0xba5   : > { %v1466_v58 = vpop.f32.mrb[20].mxu0 }
 0xba6   : > { %v1467_v59 = vadd.f32 %v1915_v57, %v1466_v58  ;;  %v2038_v60 = vpop.f32.mrb[21].mxu0 }
 0xba7   : > { %v1469_v37 = vpop.f32.mrb[22].mxu0 }
 0xba8   : > { %v1475_v61 = vmul.f32 0.70710677, %v1467_v59  ;;  %v1470_v62 = vadd.f32 %v1915_v57, %v1469_v37  ;;  %v2039_v63 = vpop.f32.mrb[23].mxu0  ;;  %v1473_v3 = vmul.f32 0.5, %v1467_v59 }
 0xbaa   : > { %2181 = verf.f32 %v1475_v61  ;;  %v1476_v0 = vmul.f32 0.70710677, %v1470_v62  ;;  %v1474_v4 = vmul.f32 0.5, %v1470_v62 }
 0xbac   : > { %2183 = verf.f32 %v1476_v0 }
 0xbb4   : > { %v2182_v1 = vpop.eup %2181 }
 0xbb5   : > { %v1479_v17 = vadd.f32 1.0, %v2182_v1 }
 0xbb6   : > { %v2184_v2 = vpop.eup %2183 }
 0xbb7   : > { %v1480_v5 = vadd.f32 1.0, %v2184_v2  ;;  %v1481_v6 = vmul.f32 %v1479_v17, %v1473_v3 }
 0xbb9   : > { %v1482_v7 = vmul.f32 %v1480_v5, %v1474_v4 }
 0xbbb   : > { %v1483_v8 = vpack.c.bf16 %v1482_v7, %v1481_v6 }
 0xbbd   : > { %2049 = vmatmul.mubr.msk.bf16.vlgmr.msra.gmra.mrb[20].mxu1 %vm1523_vm6, %v1483_v8 }
 0xbbe   : > { %2318 = shalt.err (!%p2315_p11)
}
 0xbbf   : > { %s2319_s3 = scalar_lea.hbm %s2929_s23, 256  ;;  %s2323_s25 = scalar_lea.hbm %s3100_s20, 512 }
 0xbc0   : > { %p2320_p7 = scmp.ne.s32.totalorder %s2929_s23, %s2319_s3  ;;  %p2324_p3 = scmp.lt.u32.totalorder %s2929_s23, %s3100_s20 }
 0xbc1   : > { %p2325_p4 = scmp.lt.u32.totalorder %s2323_s25, %s2319_s3  ;;  %p2327_p8 = scmp.lt.u32.totalorder %s2319_s3, %s2929_s23 }
 0xbc2   : > { %p2321_p12 = pnand %p2320_p7, %p3101_p9 }
 0xbc3   : > { %p2326_p1 = por %p2325_p4, %p2324_p3 }
 0xbc4   : > { %p2322_p6 = pneg %p2321_p12 }
 0xbc5   : > { %p2328_p10 = por %p2327_p8, %p2326_p1 }
 0xbc7   : > { %p2329_p0 = pnand %p2328_p10, %p2322_p6 }
 0xbc9   : > { %2332 = shalt.err (!%p2329_p0)
}
 0xbca   : > { %s2442_s29 = smov 128   ;;  %v1919_v9 = vld [vmem:[%s722_s11] ss:$0 sm:$0xff]  ;;  %s1611_s17 = sshll.u32 %s2783_s15, 4  ;;  %s2977_s17 = int_to_ptr.vmem [resolvable:$true] %s1611_s17 }
 0xbcb   : > { %2060 = dma.vmem_to_hbm [thread:$0]  (%p3101_p9), %s2932_s27, 256, %s2929_s23, %s1573_s6, %s2442_s29, %s2442_s29, %s2440_s22  }
 0xbcc   : > { %s3103_s27 = sld [smem:[#allocation32_spill]]  ;;  %s1578_s30 = scalar_lea.sflag [#allocation13], %s2720_s13 }
 0xbcd   : > { %s2333_s11 = scalar_lea.vmem %s2977_s17, 256  ;;  %s2443_s28 = smov [#allocation12]  }
 0xbce   : > { %p2334_p5 = scmp.ne.s32.totalorder %s2977_s17, %s2333_s11  ;;  %s2337_s19 = sshll.u32 %s2443_s28, 4  ;;  %s2338_s19 = int_to_ptr.vmem [resolvable:$false] %s2337_s19 }
 0xbcf   : > { %p2340_p11 = scmp.lt.s32.totalorder %s2977_s17, %s2338_s19 }
 0xbd0   : > { %p2335_p2 = pnand %p2334_p5, %p3101_p9 }
 0xbd2   : > { %s3104_s6 = smov %s3103_s27  ;;  %s2975_s25 = scalar_lea.hbm %s3103_s27, %s1939_s24 }
 0xbd3   : > { %p2336_p13 = pneg %p2335_p2  ;;  %s2339_s24 = scalar_lea.vmem %s2338_s19, 512 }
 0xbd4   : > { %p2341_p7 = scmp.lt.s32.totalorder %s2339_s24, %s2333_s11 }
 0xbd6   : > { %p2342_p12 = por %p2341_p7, %p2340_p11 }
 0xbd8   : > { %p2343_p6 = pnand %p2342_p12, %p2336_p13 }
 0xc90   : > { %v1561_v10 = vpop.f32.mrb[20].mxu1 }
 0xc91   : > { %v1562_v11 = vadd.f32 %v1919_v9, %v1561_v10  ;;  %v2050_v12 = vpop.f32.mrb[21].mxu1 }
 0xc92   : > { %v1564_v13 = vpop.f32.mrb[22].mxu1 }
 0xc93   : > { %1568 = vst.msk [vmem:[%s2783_s15] sm:$0xff] %vm739_vm1, %v1562_v11  ;;  %1570 = vst.msk [vmem:[#allocation2] sm:$0xff] %vm739_vm1, %v1562_v11  ;;  %v1565_v14 = vadd.f32 %v1919_v9, %v1564_v13  ;;  %v2051_v15 = vpop.f32.mrb[23].mxu1 }
 0xc95   : > { %1569 = vst.msk [vmem:[%s2783_s15 + $0x8] sm:$0xff] %vm739_vm1, %v1565_v14  ;;  %1571 = vst.msk [vmem:[#allocation2 + $0x8] sm:$0xff] %vm739_vm1, %v1565_v14 }
 0xc96   : > { %2346 = shalt.err (!%p2343_p6)
}
 0xc97   : > { %s2347_s15 = scalar_lea.hbm %s2975_s25, 256  ;;  %s2351_s21 = scalar_lea.hbm %s3104_s6, 512 }
 0xc98   : > { %p2348_p3 = scmp.ne.s32.totalorder %s2975_s25, %s2347_s15  ;;  %p2352_p8 = scmp.lt.u32.totalorder %s2975_s25, %s3104_s6 }
 0xc99   : > { %p2353_p10 = scmp.lt.u32.totalorder %s2351_s21, %s2347_s15  ;;  %p2355_p5 = scmp.lt.u32.totalorder %s2347_s15, %s2975_s25 }
 0xc9a   : > { %p2349_p4 = pnand %p2348_p3, %p3101_p9 }
 0xc9b   : > { %p2354_p0 = por %p2353_p10, %p2352_p8 }
 0xc9c   : > { %p2350_p1 = pneg %p2349_p4 }
 0xc9d   : > { %p2356_p2 = por %p2355_p5, %p2354_p0 }
 0xc9f   : > { %p2357_p13 = pnand %p2356_p2, %p2350_p1 }
 0xca1   : > { %2360 = shalt.err (!%p2357_p13)
}
 0xca2   : > { %2061 = dma.vmem_to_hbm [thread:$0]  (%p3101_p9), %s2977_s17, 256, %s2975_s25, %s1578_s30, %s2442_s29, %s2442_s29, %s2440_s22  }
 0xca3 PF: > { %s3105_s23 = sld [smem:[#allocation19_spill]]  ;;  %s3106_s27 = sld [smem:[#allocation26_spill]] }
 0xca4   : > { %s3107_s11 = sld [smem:[#allocation22_spill]] }
 0xca9   : > { %s1626_s28 = sand.u32 1, %s3105_s23   ;;  %p3108_p11 = scmp.ne.s32.totalorder %s3106_s27, 0 }
 0xcaa   : > { %p3109_p7 = scmp.ge.s32.totalorder %s3107_s11, 2  ;;  %s1627_s19 = scalar_lea.sflag [#allocation5], %s1626_s28 }
 0xcac   : > { %p2078_p12 = pnand %p3109_p7, %p3108_p11 }
 0xcae   : > { %2398 = dma.done.wait (!%p2078_p12), %s1627_s19, 256  }
 0xcaf   : > { %2400 = vsyncadd (!%p2078_p12), %s1627_s19, 4294967040  ;;  %s1636_s16 = scalar_lea.sflag [#allocation13], %s1626_s28 }
 0xcb0   : > { %2402 = dma.done.wait (!%p2078_p12), %s1636_s16, 256  }
 0xcb1   : > { %2404 = vsyncadd (!%p2078_p12), %s1636_s16, 4294967040  ;;  %s39_s30 = sadd.s32 1, %s3107_s11   ;;  %s3110_s13 = sld [smem:[#allocation20_spill]] }
 0xcb2   : > { %p36_p6 = scmp.ge.s32.totalorder %s39_s30, 4   ;;  %s3111_s27 = sld [smem:[#allocation25_spill]] }
 0xcb3   : > { %s3112_s28 = sld [smem:[#allocation21_spill]]  ;;  %s3113_s29 = sld [smem:[#allocation23_spill]] }
 0xcb4   : > { %s3114_s25 = smov %s2411_s26  ;;  %38 = sbr.rel (!%p36_p6) target bundleno = 19 (0x13), region = 195 }
 0xcb7   : > { %s3115_s26 = smov %s3110_s13 }
 0xcbb   :  { %1641 = vsyncpa [#allocation4], 1 }
 0xcbc   :  { %1643 = vsyncpa [#allocation4 + $0x1], 1 }
 0xcbd   :  { %1644 = vsyncpa [#allocation7], 1 }
 0xcbe   :  { %1646 = vsyncpa [#allocation7 + $0x1], 1 }
 0xcbf   :  { %1647 = vsyncpa [#allocation10], 1 }
 0xcc0   :  { %1649 = vsyncpa [#allocation10 + $0x1], 1 }
 0xcc1   :  { %1650 = vsyncpa [#allocation5], 1 }
 0xcc2   :  { %1652 = vsyncpa [#allocation5 + $0x1], 1 }
 0xcc3   :  { %1653 = vsyncpa [#allocation13], 1 }
 0xcc4   :  { %1655 = vsyncpa [#allocation13 + $0x1], 1 }

</bundles_post_ra>
